<compile_context>
chip_gen: v7x
topology: tpu7x:2x2x1
jax: 0.10.0
libtpu: 0.0.40
codegen_flags: <defaults>
</compile_context>

<pallas_src>
import jax
import jax.numpy as jnp
from jax.experimental import pallas as pl
from jax.experimental.pallas import tpu as pltpu

LANE = 128
BN_EPS = 1e-5


def _round_up(v, m):
    return (v + m - 1) // m * m


# ----------------------------------------------------------------------------
# Kernel
# ----------------------------------------------------------------------------
def _make_basic_block_kernel(tb, hout, wout, k1, cout_p, wpad):
    p = tb * hout * wout

    def kernel(xt_ref, w1_ref, w2_ref, ws_ref, b_ref, o_ref, ypad_ref):
        # --- conv1 (+ folded BN1) + ReLU: one MXU matmul over the packed taps ---
        x2d = xt_ref[...].reshape(p, k1)
        h1 = jnp.dot(x2d, w1_ref[...], preferred_element_type=jnp.float32)
        h1 = jnp.maximum(h1 + b_ref[0], 0.0)

        # --- zero only the halo strips of the conv2 scratch; the interior is
        #     fully overwritten below.  All strips are sublane/lane aligned. ---
        ypad_ref[:, 0:1, :, :] = jnp.zeros((tb, 1, wpad, cout_p), jnp.float32)
        ypad_ref[:, hout + 1:hout + 2, :, :] = jnp.zeros((tb, 1, wpad, cout_p), jnp.float32)
        ypad_ref[:, 1:1 + hout, 0:8, :] = jnp.zeros((tb, hout, 8, cout_p), jnp.float32)
        ypad_ref[:, 1:1 + hout, 8 + wout:wpad, :] = jnp.zeros((tb, hout, 8, cout_p), jnp.float32)

        # --- stage h1 into the scratch (interior at 8-aligned column 8) ---
        ypad_ref[:, 1:1 + hout, 8:8 + wout, :] = h1.reshape(tb, hout, wout, cout_p)

        # --- conv2 (+ folded BN2): 9 shifted-window matmuls, f32 accumulation.
        #     Centre tap (k == 4) reuses h1 directly (no scratch reload). ---
        acc = jnp.dot(h1, w2_ref[4], preferred_element_type=jnp.float32)
        for k in range(9):
            if k == 4:
                continue
            dy, dx = divmod(k, 3)
            tap = ypad_ref[:, dy:dy + hout, 7 + dx:7 + dx + wout, :]
            acc = acc + jnp.dot(tap.reshape(p, cout_p), w2_ref[k],
                                preferred_element_type=jnp.float32)
        y2 = acc + b_ref[1]

        # --- shortcut: single matmul against the embedded weight (projection
        #     or identity), reading the centre-tap rows of the packed im2col ---
        sc = jnp.dot(x2d, ws_ref[...], preferred_element_type=jnp.float32) + b_ref[2]

        o_ref[...] = jnp.maximum(y2 + sc, 0.0).reshape(tb, hout, wout, cout_p)

    return kernel


# ----------------------------------------------------------------------------
# Wrapper-side packing helpers (pure XLA, run once per call)
# ----------------------------------------------------------------------------
def _fold_bn(w, gamma, beta, mean, var):
    """Fold an eval-mode BatchNorm into the preceding bias-free conv."""
    scale = gamma * jax.lax.rsqrt(var + BN_EPS)
    return w * scale[:, None, None, None], beta - mean * scale


def _pack_w1(w, k1, cout_p):
    """(Cout, Cin, 3, 3) torch layout -> (K1, Cout_p); row = (3*dy+dx)*Cin + ci."""
    co, ci = w.shape[0], w.shape[1]
    wt = jnp.transpose(w, (2, 3, 1, 0)).reshape(9 * ci, co)       # (9*Cin, Cout)
    return jnp.pad(wt, ((0, k1 - 9 * ci), (0, cout_p - co)))


def _pack_w2(w, ci_p, co_p):
    """(Cout, Cin, 3, 3) -> (9, Cin_p, Cout_p), tap-major (k = 3*dy + dx)."""
    co, ci = w.shape[0], w.shape[1]
    wt = jnp.transpose(w, (2, 3, 1, 0))                           # (3, 3, Cin, Cout)
    wt = jnp.pad(wt, ((0, 0), (0, 0), (0, ci_p - ci), (0, co_p - co)))
    return wt.reshape(9, ci_p, co_p)


def _im2col_3x3_packed(x_nhwc, stride, k1):
    """x (N,H,W,C) -> (N,Hout,Wout,K1); tap k occupies channels [k*C, (k+1)*C)."""
    n, h, w, c = x_nhwc.shape
    hout = (h + 2 - 3) // stride + 1
    wout = (w + 2 - 3) // stride + 1
    xp = jnp.pad(x_nhwc, ((0, 0), (1, 1), (1, 1), (0, 0)))
    taps = []
    for dy in range(3):
        for dx in range(3):
            taps.append(xp[:, dy:dy + stride * (hout - 1) + 1:stride,
                           dx:dx + stride * (wout - 1) + 1:stride, :])
    xt = jnp.stack(taps, axis=3).reshape(n, hout, wout, 9 * c)    # tap-major
    xt = jnp.pad(xt, ((0, 0), (0, 0), (0, 0), (0, k1 - 9 * c)))
    return xt, hout, wout


# ----------------------------------------------------------------------------
# Forward pass
# ----------------------------------------------------------------------------
def basic_block_forward(x_nchw, params, stride, *, block_batch=1):
    n, cin, h, w = x_nchw.shape
    cout = params["conv1_w"].shape[0]
    has_proj = stride != 1
    if not has_proj:
        assert cin == cout, "identity shortcut requires in_channels == out_channels"

    k1 = _round_up(9 * cin, LANE)          # packed im2col contraction width
    cout_p = _round_up(cout, LANE)

    # Fold BN (eval mode) into the convs; pack weights lane-dense.
    w1f, b1f = _fold_bn(params["conv1_w"], params["bn1_gamma"], params["bn1_beta"],
                        params["bn1_mean"], params["bn1_var"])
    w2f, b2f = _fold_bn(params["conv2_w"], params["bn2_gamma"], params["bn2_beta"],
                        params["bn2_mean"], params["bn2_var"])
    w1_pack = _pack_w1(w1f, k1, cout_p)
    w2_pack = _pack_w2(w2f, cout_p, cout_p)

    # Shortcut weight embedded at the centre-tap rows of the packed im2col.
    ws_embed = jnp.zeros((k1, cout_p), jnp.float32)
    biases = jnp.zeros((3, 1, cout_p), jnp.float32)
    biases = biases.at[0, 0, :cout].set(b1f).at[1, 0, :cout].set(b2f)
    if has_proj:
        wsf, bsf = _fold_bn(params["sc_w"], params["bn_sc_gamma"], params["bn_sc_beta"],
                            params["bn_sc_mean"], params["bn_sc_var"])
        sc_mat = jnp.transpose(wsf[:, :, 0, 0], (1, 0))            # (Cin, Cout)
        ws_embed = ws_embed.at[4 * cin:5 * cin, :cout].set(sc_mat)
        biases = biases.at[2, 0, :cout].set(bsf)
    else:
        # identity shortcut == centre tap of the (stride-1) im2col
        ws_embed = ws_embed.at[4 * cin:5 * cin, :cout].set(jnp.eye(cin, dtype=jnp.float32))

    x_nhwc = jnp.transpose(x_nchw, (0, 2, 3, 1)).astype(jnp.float32)
    xt, hout, wout = _im2col_3x3_packed(x_nhwc, stride, k1)

    tb = block_batch
    assert n % tb == 0, "batch must be divisible by block_batch"
    assert wout % 8 == 0, "output width must be a multiple of 8 (sublane tile)"
    grid = (n // tb,)
    wpad = wout + 16                        # scratch W extent; interior at col 8

    kernel = _make_basic_block_kernel(tb, hout, wout, k1, cout_p, wpad)

    in_specs = [
        pl.BlockSpec((tb, hout, wout, k1), lambda b: (b, 0, 0, 0)),
        pl.BlockSpec((k1, cout_p), lambda b: (0, 0)),              # resident
        pl.BlockSpec((9, cout_p, cout_p), lambda b: (0, 0, 0)),    # resident
        pl.BlockSpec((k1, cout_p), lambda b: (0, 0)),              # resident
        pl.BlockSpec((3, 1, cout_p), lambda b: (0, 0, 0)),         # resident
    ]
    args = [xt, w1_pack, w2_pack, ws_embed, biases]

    flops = 2 * n * hout * wout * (k1 * cout_p + 9 * cout_p * cout_p + k1 * cout_p)
    bytes_accessed = sum(int(a.size) * a.dtype.itemsize for a in args) \
        + n * hout * wout * cout_p * 4

    out_padded = pl.pallas_call(
        kernel,
        out_shape=jax.ShapeDtypeStruct((n, hout, wout, cout_p), jnp.float32),
        grid_spec=pltpu.PrefetchScalarGridSpec(
            num_scalar_prefetch=0,
            grid=grid,
            in_specs=in_specs,
            out_specs=pl.BlockSpec((tb, hout, wout, cout_p), lambda b: (b, 0, 0, 0)),
            scratch_shapes=[pltpu.VMEM((tb, hout + 2, wpad, cout_p), jnp.float32)],
        ),
        compiler_params=pltpu.CompilerParams(
            dimension_semantics=("parallel",),
            vmem_limit_bytes=32 * 1024 * 1024,
        ),
        cost_estimate=pl.CostEstimate(flops=int(flops), transcendentals=0,
                                      bytes_accessed=int(bytes_accessed)),
    )(*args)

    out = out_padded[..., :cout]                 # drop channel padding (wrapper slice)
    return jnp.transpose(out, (0, 3, 1, 2))      # back to NCHW


# ----------------------------------------------------------------------------
# Deterministic init + pure-JAX reference (eval-mode BN)
# ----------------------------------------------------------------------------
def init_basic_block_params(key, in_channels, out_channels, stride):
    ks = iter(jax.random.split(key, 16))

    def conv_w(k, co, ci, kh, kw):
        bound = 1.0 / jnp.sqrt(ci * kh * kw)
        return jax.random.uniform(k, (co, ci, kh, kw), jnp.float32, -bound, bound)

    def bn(prefix, k, c):
        k1, k2, k3, k4 = jax.random.split(k, 4)
        return {
            f"{prefix}_gamma": jax.random.uniform(k1, (c,), jnp.float32, 0.5, 1.5),
            f"{prefix}_beta": jax.random.uniform(k2, (c,), jnp.float32, -0.5, 0.5),
            f"{prefix}_mean": jax.random.normal(k3, (c,), jnp.float32) * 0.3,
            f"{prefix}_var": jax.random.uniform(k4, (c,), jnp.float32, 0.5, 1.5),
        }

    params = {"conv1_w": conv_w(next(ks), out_channels, in_channels, 3, 3),
              "conv2_w": conv_w(next(ks), out_channels, out_channels, 3, 3)}
    params.update(bn("bn1", next(ks), out_channels))
    params.update(bn("bn2", next(ks), out_channels))
    if stride != 1:
        params["sc_w"] = conv_w(next(ks), out_channels, in_channels, 1, 1)
        params.update(bn("bn_sc", next(ks), out_channels))
    return params


def basic_block_reference(x, params, stride):
    def conv(y, w, s, p):
        return jax.lax.conv_general_dilated(
            y, w, window_strides=(s, s), padding=[(p, p), (p, p)],
            dimension_numbers=("NCHW", "OIHW", "NCHW"),
            precision=jax.lax.Precision.HIGHEST)

    def bn(y, prefix):
        g, b = params[f"{prefix}_gamma"], params[f"{prefix}_beta"]
        m, v = params[f"{prefix}_mean"], params[f"{prefix}_var"]
        scale = g * jax.lax.rsqrt(v + BN_EPS)
        return y * scale[None, :, None, None] + (b - m * scale)[None, :, None, None]

    h = jax.nn.relu(bn(conv(x, params["conv1_w"], stride, 1), "bn1"))
    h = bn(conv(h, params["conv2_w"], 1, 1), "bn2")
    sc = x if stride == 1 else bn(conv(x, params["sc_w"], stride, 0), "bn_sc")
    return jax.nn.relu(h + sc)


if __name__ == "__main__":
    key = jax.random.PRNGKey(0)
    k1, k2, k3, k4 = jax.random.split(key, 4)

    # Case 1: projection shortcut (stride=2, channel expansion).
    batch, cin, cout, hw, stride = 2, 8, 16, 16, 2
    params = init_basic_block_params(k1, cin, cout, stride)
    x = jax.random.normal(k2, (batch, cin, hw, hw), jnp.float32)
    out = jax.block_until_ready(basic_block_forward(x, params, stride))
    ref = basic_block_reference(x, params, stride)
    assert out.shape == (batch, cout, hw // stride, hw // stride), out.shape
    err = float(jnp.max(jnp.abs(out - ref)))
    assert jnp.allclose(out, ref, atol=1e-3, rtol=1e-3), err

    # Case 2: identity shortcut (stride=1, same channels).
    batch, cin, cout, hw, stride = 2, 8, 8, 16, 1
    params = init_basic_block_params(k3, cin, cout, stride)
    x = jax.random.normal(k4, (batch, cin, hw, hw), jnp.float32)
    out = jax.block_until_ready(basic_block_forward(x, params, stride))
    ref = basic_block_reference(x, params, stride)
    assert out.shape == (batch, cout, hw, hw), out.shape
    err = float(jnp.max(jnp.abs(out - ref)))
    assert jnp.allclose(out, ref, atol=1e-3, rtol=1e-3), err

    print("KERNEL_OK")
</pallas_src>

<mosaic_0001>
module attributes {stable_mosaic.version = 11 : i64} {
  func.func @kernel(%arg0: i32, %arg1: memref<1x8x8x128xf32, #tpu.memory_space<vmem>>, %arg2: memref<128x128xf32, #tpu.memory_space<vmem>>, %arg3: memref<9x128x128xf32, #tpu.memory_space<vmem>>, %arg4: memref<128x128xf32, #tpu.memory_space<vmem>>, %arg5: memref<3x1x128xf32, #tpu.memory_space<vmem>>, %arg6: memref<1x8x8x128xf32, #tpu.memory_space<vmem>>, %arg7: memref<1x10x24x128xf32, #tpu.memory_space<vmem>>) attributes {dimension_semantics = [#tpu.dimension_semantics<parallel>], iteration_bounds = array<i64: 2>, scalar_prefetch = 0 : i64, scratch_operands = 1 : i64, tpu.core_type = #tpu.core_type<tc>, window_params = [{transform_indices = @transform_0, window_bounds = array<i64: 1, 8, 8, 128>}, {pipeline_mode = #tpu.pipeline_mode<synchronous>, transform_indices = @transform_1, window_bounds = array<i64: 128, 128>}, {pipeline_mode = #tpu.pipeline_mode<synchronous>, transform_indices = @transform_2, window_bounds = array<i64: 9, 128, 128>}, {pipeline_mode = #tpu.pipeline_mode<synchronous>, transform_indices = @transform_3, window_bounds = array<i64: 128, 128>}, {pipeline_mode = #tpu.pipeline_mode<synchronous>, transform_indices = @transform_4, window_bounds = array<i64: 3, 1, 128>}, {transform_indices = @transform_5, window_bounds = array<i64: 1, 8, 8, 128>}]} {
    %c0 = arith.constant 0 : index
    %c0_0 = arith.constant 0 : index
    %c0_1 = arith.constant 0 : index
    %c0_2 = arith.constant 0 : index
    %0 = vector.load %arg1[%c0, %c0_0, %c0_1, %c0_2] : memref<1x8x8x128xf32, #tpu.memory_space<vmem>>, vector<1x8x8x128xf32>
    %1 = vector.shape_cast %0 : vector<1x8x8x128xf32> to vector<64x128xf32>
    %c0_3 = arith.constant 0 : index
    %c0_4 = arith.constant 0 : index
    %2 = vector.load %arg2[%c0_3, %c0_4] : memref<128x128xf32, #tpu.memory_space<vmem>>, vector<128x128xf32>
    %cst = arith.constant dense<0.000000e+00> : vector<64x128xf32>
    %3 = tpu.matmul %1, %2, %cst {dimension_numbers = #tpu.dot_dimension_numbers<[1], [0], [0], [1], [0, 0, 1, 1], [], []>} : vector<64x128xf32>, vector<128x128xf32>, vector<64x128xf32> -> vector<64x128xf32>
    %c0_5 = arith.constant 0 : index
    %c0_6 = arith.constant 0 : index
    %c0_7 = arith.constant 0 : index
    %4 = vector.load %arg5[%c0_5, %c0_6, %c0_7] : memref<3x1x128xf32, #tpu.memory_space<vmem>>, vector<1x1x128xf32>
    %5 = vector.shape_cast %4 : vector<1x1x128xf32> to vector<1x128xf32>
    %6 = vector.broadcast %5 : vector<1x128xf32> to vector<64x128xf32>
    %7 = arith.addf %3, %6 : vector<64x128xf32>
    %cst_8 = arith.constant 0.000000e+00 : f32
    %8 = vector.broadcast %cst_8 : f32 to vector<64x128xf32>
    %9 = arith.maximumf %7, %8 : vector<64x128xf32>
    %cst_9 = arith.constant 0.000000e+00 : f32
    %10 = vector.broadcast %cst_9 : f32 to vector<1x1x24x128xf32>
    %c0_10 = arith.constant 0 : index
    %c0_11 = arith.constant 0 : index
    %c0_12 = arith.constant 0 : index
    %c0_13 = arith.constant 0 : index
    %11 = vector.load %arg7[%c0_10, %c0_11, %c0_12, %c0_13] : memref<1x10x24x128xf32, #tpu.memory_space<vmem>>, vector<1x1x24x128xf32>
    tpu.vector_store %arg7[%c0_10, %c0_11, %c0_12, %c0_13], %10 {strides = array<i32>} : memref<1x10x24x128xf32, #tpu.memory_space<vmem>>, vector<1x1x24x128xf32>,
    %cst_14 = arith.constant 0.000000e+00 : f32
    %12 = vector.broadcast %cst_14 : f32 to vector<1x1x24x128xf32>
    %c0_15 = arith.constant 0 : index
    %c9 = arith.constant 9 : index
    %c0_16 = arith.constant 0 : index
    %c0_17 = arith.constant 0 : index
    %13 = vector.load %arg7[%c0_15, %c9, %c0_16, %c0_17] : memref<1x10x24x128xf32, #tpu.memory_space<vmem>>, vector<1x1x24x128xf32>
    tpu.vector_store %arg7[%c0_15, %c9, %c0_16, %c0_17], %12 {strides = array<i32>} : memref<1x10x24x128xf32, #tpu.memory_space<vmem>>, vector<1x1x24x128xf32>,
    %cst_18 = arith.constant 0.000000e+00 : f32
    %14 = vector.broadcast %cst_18 : f32 to vector<1x8x8x128xf32>
    %c0_19 = arith.constant 0 : index
    %c1 = arith.constant 1 : index
    %c0_20 = arith.constant 0 : index
    %c0_21 = arith.constant 0 : index
    %15 = vector.load %arg7[%c0_19, %c1, %c0_20, %c0_21] : memref<1x10x24x128xf32, #tpu.memory_space<vmem>>, vector<1x8x8x128xf32>
    tpu.vector_store %arg7[%c0_19, %c1, %c0_20, %c0_21], %14 {strides = array<i32>} : memref<1x10x24x128xf32, #tpu.memory_space<vmem>>, vector<1x8x8x128xf32>,
    %cst_22 = arith.constant 0.000000e+00 : f32
    %16 = vector.broadcast %cst_22 : f32 to vector<1x8x8x128xf32>
    %c0_23 = arith.constant 0 : index
    %c1_24 = arith.constant 1 : index
    %c16 = arith.constant 16 : index
    %c0_25 = arith.constant 0 : index
    %17 = vector.load %arg7[%c0_23, %c1_24, %c16, %c0_25] : memref<1x10x24x128xf32, #tpu.memory_space<vmem>>, vector<1x8x8x128xf32>
    tpu.vector_store %arg7[%c0_23, %c1_24, %c16, %c0_25], %16 {strides = array<i32>} : memref<1x10x24x128xf32, #tpu.memory_space<vmem>>, vector<1x8x8x128xf32>,
    %18 = vector.shape_cast %9 : vector<64x128xf32> to vector<1x8x8x128xf32>
    %c0_26 = arith.constant 0 : index
    %c1_27 = arith.constant 1 : index
    %c8 = arith.constant 8 : index
    %c0_28 = arith.constant 0 : index
    %19 = vector.load %arg7[%c0_26, %c1_27, %c8, %c0_28] : memref<1x10x24x128xf32, #tpu.memory_space<vmem>>, vector<1x8x8x128xf32>
    tpu.vector_store %arg7[%c0_26, %c1_27, %c8, %c0_28], %18 {strides = array<i32>} : memref<1x10x24x128xf32, #tpu.memory_space<vmem>>, vector<1x8x8x128xf32>,
    %c4 = arith.constant 4 : index
    %c0_29 = arith.constant 0 : index
    %c0_30 = arith.constant 0 : index
    %20 = vector.load %arg3[%c4, %c0_29, %c0_30] : memref<9x128x128xf32, #tpu.memory_space<vmem>>, vector<1x128x128xf32>
    %21 = vector.shape_cast %20 : vector<1x128x128xf32> to vector<128x128xf32>
    %cst_31 = arith.constant dense<0.000000e+00> : vector<64x128xf32>
    %22 = tpu.matmul %9, %21, %cst_31 {dimension_numbers = #tpu.dot_dimension_numbers<[1], [0], [0], [1], [0, 0, 1, 1], [], []>} : vector<64x128xf32>, vector<128x128xf32>, vector<64x128xf32> -> vector<64x128xf32>
    %c0_32 = arith.constant 0 : index
    %c0_33 = arith.constant 0 : index
    %c7 = arith.constant 7 : index
    %c0_34 = arith.constant 0 : index
    %23 = vector.load %arg7[%c0_32, %c0_33, %c7, %c0_34] : memref<1x10x24x128xf32, #tpu.memory_space<vmem>>, vector<1x8x8x128xf32>
    %24 = vector.shape_cast %23 : vector<1x8x8x128xf32> to vector<64x128xf32>
    %c0_35 = arith.constant 0 : index
    %c0_36 = arith.constant 0 : index
    %c0_37 = arith.constant 0 : index
    %25 = vector.load %arg3[%c0_35, %c0_36, %c0_37] : memref<9x128x128xf32, #tpu.memory_space<vmem>>, vector<1x128x128xf32>
    %26 = vector.shape_cast %25 : vector<1x128x128xf32> to vector<128x128xf32>
    %cst_38 = arith.constant dense<0.000000e+00> : vector<64x128xf32>
    %27 = tpu.matmul %24, %26, %cst_38 {dimension_numbers = #tpu.dot_dimension_numbers<[1], [0], [0], [1], [0, 0, 1, 1], [], []>} : vector<64x128xf32>, vector<128x128xf32>, vector<64x128xf32> -> vector<64x128xf32>
    %28 = arith.addf %22, %27 : vector<64x128xf32>
    %c0_39 = arith.constant 0 : index
    %c0_40 = arith.constant 0 : index
    %c8_41 = arith.constant 8 : index
    %c0_42 = arith.constant 0 : index
    %29 = vector.load %arg7[%c0_39, %c0_40, %c8_41, %c0_42] : memref<1x10x24x128xf32, #tpu.memory_space<vmem>>, vector<1x8x8x128xf32>
    %30 = vector.shape_cast %29 : vector<1x8x8x128xf32> to vector<64x128xf32>
    %c1_43 = arith.constant 1 : index
    %c0_44 = arith.constant 0 : index
    %c0_45 = arith.constant 0 : index
    %31 = vector.load %arg3[%c1_43, %c0_44, %c0_45] : memref<9x128x128xf32, #tpu.memory_space<vmem>>, vector<1x128x128xf32>
    %32 = vector.shape_cast %31 : vector<1x128x128xf32> to vector<128x128xf32>
    %cst_46 = arith.constant dense<0.000000e+00> : vector<64x128xf32>
    %33 = tpu.matmul %30, %32, %cst_46 {dimension_numbers = #tpu.dot_dimension_numbers<[1], [0], [0], [1], [0, 0, 1, 1], [], []>} : vector<64x128xf32>, vector<128x128xf32>, vector<64x128xf32> -> vector<64x128xf32>
    %34 = arith.addf %28, %33 : vector<64x128xf32>
    %c0_47 = arith.constant 0 : index
    %c0_48 = arith.constant 0 : index
    %c9_49 = arith.constant 9 : index
    %c0_50 = arith.constant 0 : index
    %35 = vector.load %arg7[%c0_47, %c0_48, %c9_49, %c0_50] : memref<1x10x24x128xf32, #tpu.memory_space<vmem>>, vector<1x8x8x128xf32>
    %36 = vector.shape_cast %35 : vector<1x8x8x128xf32> to vector<64x128xf32>
    %c2 = arith.constant 2 : index
    %c0_51 = arith.constant 0 : index
    %c0_52 = arith.constant 0 : index
    %37 = vector.load %arg3[%c2, %c0_51, %c0_52] : memref<9x128x128xf32, #tpu.memory_space<vmem>>, vector<1x128x128xf32>
    %38 = vector.shape_cast %37 : vector<1x128x128xf32> to vector<128x128xf32>
    %cst_53 = arith.constant dense<0.000000e+00> : vector<64x128xf32>
    %39 = tpu.matmul %36, %38, %cst_53 {dimension_numbers = #tpu.dot_dimension_numbers<[1], [0], [0], [1], [0, 0, 1, 1], [], []>} : vector<64x128xf32>, vector<128x128xf32>, vector<64x128xf32> -> vector<64x128xf32>
    %40 = arith.addf %34, %39 : vector<64x128xf32>
    %c0_54 = arith.constant 0 : index
    %c1_55 = arith.constant 1 : index
    %c7_56 = arith.constant 7 : index
    %c0_57 = arith.constant 0 : index
    %41 = vector.load %arg7[%c0_54, %c1_55, %c7_56, %c0_57] : memref<1x10x24x128xf32, #tpu.memory_space<vmem>>, vector<1x8x8x128xf32>
    %42 = vector.shape_cast %41 : vector<1x8x8x128xf32> to vector<64x128xf32>
    %c3 = arith.constant 3 : index
    %c0_58 = arith.constant 0 : index
    %c0_59 = arith.constant 0 : index
    %43 = vector.load %arg3[%c3, %c0_58, %c0_59] : memref<9x128x128xf32, #tpu.memory_space<vmem>>, vector<1x128x128xf32>
    %44 = vector.shape_cast %43 : vector<1x128x128xf32> to vector<128x128xf32>
    %cst_60 = arith.constant dense<0.000000e+00> : vector<64x128xf32>
    %45 = tpu.matmul %42, %44, %cst_60 {dimension_numbers = #tpu.dot_dimension_numbers<[1], [0], [0], [1], [0, 0, 1, 1], [], []>} : vector<64x128xf32>, vector<128x128xf32>, vector<64x128xf32> -> vector<64x128xf32>
    %46 = arith.addf %40, %45 : vector<64x128xf32>
    %c0_61 = arith.constant 0 : index
    %c1_62 = arith.constant 1 : index
    %c9_63 = arith.constant 9 : index
    %c0_64 = arith.constant 0 : index
    %47 = vector.load %arg7[%c0_61, %c1_62, %c9_63, %c0_64] : memref<1x10x24x128xf32, #tpu.memory_space<vmem>>, vector<1x8x8x128xf32>
    %48 = vector.shape_cast %47 : vector<1x8x8x128xf32> to vector<64x128xf32>
    %c5 = arith.constant 5 : index
    %c0_65 = arith.constant 0 : index
    %c0_66 = arith.constant 0 : index
    %49 = vector.load %arg3[%c5, %c0_65, %c0_66] : memref<9x128x128xf32, #tpu.memory_space<vmem>>, vector<1x128x128xf32>
    %50 = vector.shape_cast %49 : vector<1x128x128xf32> to vector<128x128xf32>
    %cst_67 = arith.constant dense<0.000000e+00> : vector<64x128xf32>
    %51 = tpu.matmul %48, %50, %cst_67 {dimension_numbers = #tpu.dot_dimension_numbers<[1], [0], [0], [1], [0, 0, 1, 1], [], []>} : vector<64x128xf32>, vector<128x128xf32>, vector<64x128xf32> -> vector<64x128xf32>
    %52 = arith.addf %46, %51 : vector<64x128xf32>
    %c0_68 = arith.constant 0 : index
    %c2_69 = arith.constant 2 : index
    %c7_70 = arith.constant 7 : index
    %c0_71 = arith.constant 0 : index
    %53 = vector.load %arg7[%c0_68, %c2_69, %c7_70, %c0_71] : memref<1x10x24x128xf32, #tpu.memory_space<vmem>>, vector<1x8x8x128xf32>
    %54 = vector.shape_cast %53 : vector<1x8x8x128xf32> to vector<64x128xf32>
    %c6 = arith.constant 6 : index
    %c0_72 = arith.constant 0 : index
    %c0_73 = arith.constant 0 : index
    %55 = vector.load %arg3[%c6, %c0_72, %c0_73] : memref<9x128x128xf32, #tpu.memory_space<vmem>>, vector<1x128x128xf32>
    %56 = vector.shape_cast %55 : vector<1x128x128xf32> to vector<128x128xf32>
    %cst_74 = arith.constant dense<0.000000e+00> : vector<64x128xf32>
    %57 = tpu.matmul %54, %56, %cst_74 {dimension_numbers = #tpu.dot_dimension_numbers<[1], [0], [0], [1], [0, 0, 1, 1], [], []>} : vector<64x128xf32>, vector<128x128xf32>, vector<64x128xf32> -> vector<64x128xf32>
    %58 = arith.addf %52, %57 : vector<64x128xf32>
    %c0_75 = arith.constant 0 : index
    %c2_76 = arith.constant 2 : index
    %c8_77 = arith.constant 8 : index
    %c0_78 = arith.constant 0 : index
    %59 = vector.load %arg7[%c0_75, %c2_76, %c8_77, %c0_78] : memref<1x10x24x128xf32, #tpu.memory_space<vmem>>, vector<1x8x8x128xf32>
    %60 = vector.shape_cast %59 : vector<1x8x8x128xf32> to vector<64x128xf32>
    %c7_79 = arith.constant 7 : index
    %c0_80 = arith.constant 0 : index
    %c0_81 = arith.constant 0 : index
    %61 = vector.load %arg3[%c7_79, %c0_80, %c0_81] : memref<9x128x128xf32, #tpu.memory_space<vmem>>, vector<1x128x128xf32>
    %62 = vector.shape_cast %61 : vector<1x128x128xf32> to vector<128x128xf32>
    %cst_82 = arith.constant dense<0.000000e+00> : vector<64x128xf32>
    %63 = tpu.matmul %60, %62, %cst_82 {dimension_numbers = #tpu.dot_dimension_numbers<[1], [0], [0], [1], [0, 0, 1, 1], [], []>} : vector<64x128xf32>, vector<128x128xf32>, vector<64x128xf32> -> vector<64x128xf32>
    %64 = arith.addf %58, %63 : vector<64x128xf32>
    %c0_83 = arith.constant 0 : index
    %c2_84 = arith.constant 2 : index
    %c9_85 = arith.constant 9 : index
    %c0_86 = arith.constant 0 : index
    %65 = vector.load %arg7[%c0_83, %c2_84, %c9_85, %c0_86] : memref<1x10x24x128xf32, #tpu.memory_space<vmem>>, vector<1x8x8x128xf32>
    %66 = vector.shape_cast %65 : vector<1x8x8x128xf32> to vector<64x128xf32>
    %c8_87 = arith.constant 8 : index
    %c0_88 = arith.constant 0 : index
    %c0_89 = arith.constant 0 : index
    %67 = vector.load %arg3[%c8_87, %c0_88, %c0_89] : memref<9x128x128xf32, #tpu.memory_space<vmem>>, vector<1x128x128xf32>
    %68 = vector.shape_cast %67 : vector<1x128x128xf32> to vector<128x128xf32>
    %cst_90 = arith.constant dense<0.000000e+00> : vector<64x128xf32>
    %69 = tpu.matmul %66, %68, %cst_90 {dimension_numbers = #tpu.dot_dimension_numbers<[1], [0], [0], [1], [0, 0, 1, 1], [], []>} : vector<64x128xf32>, vector<128x128xf32>, vector<64x128xf32> -> vector<64x128xf32>
    %70 = arith.addf %64, %69 : vector<64x128xf32>
    %c1_91 = arith.constant 1 : index
    %c0_92 = arith.constant 0 : index
    %c0_93 = arith.constant 0 : index
    %71 = vector.load %arg5[%c1_91, %c0_92, %c0_93] : memref<3x1x128xf32, #tpu.memory_space<vmem>>, vector<1x1x128xf32>
    %72 = vector.shape_cast %71 : vector<1x1x128xf32> to vector<1x128xf32>
    %73 = vector.broadcast %72 : vector<1x128xf32> to vector<64x128xf32>
    %74 = arith.addf %70, %73 : vector<64x128xf32>
    %c0_94 = arith.constant 0 : index
    %c0_95 = arith.constant 0 : index
    %75 = vector.load %arg4[%c0_94, %c0_95] : memref<128x128xf32, #tpu.memory_space<vmem>>, vector<128x128xf32>
    %cst_96 = arith.constant dense<0.000000e+00> : vector<64x128xf32>
    %76 = tpu.matmul %1, %75, %cst_96 {dimension_numbers = #tpu.dot_dimension_numbers<[1], [0], [0], [1], [0, 0, 1, 1], [], []>} : vector<64x128xf32>, vector<128x128xf32>, vector<64x128xf32> -> vector<64x128xf32>
    %c2_97 = arith.constant 2 : index
    %c0_98 = arith.constant 0 : index
    %c0_99 = arith.constant 0 : index
    %77 = vector.load %arg5[%c2_97, %c0_98, %c0_99] : memref<3x1x128xf32, #tpu.memory_space<vmem>>, vector<1x1x128xf32>
    %78 = vector.shape_cast %77 : vector<1x1x128xf32> to vector<1x128xf32>
    %79 = vector.broadcast %78 : vector<1x128xf32> to vector<64x128xf32>
    %80 = arith.addf %76, %79 : vector<64x128xf32>
    %81 = arith.addf %74, %80 : vector<64x128xf32>
    %cst_100 = arith.constant 0.000000e+00 : f32
    %82 = vector.broadcast %cst_100 : f32 to vector<64x128xf32>
    %83 = arith.maximumf %81, %82 : vector<64x128xf32>
    %84 = vector.shape_cast %83 : vector<64x128xf32> to vector<1x8x8x128xf32>
    %c0_101 = arith.constant 0 : index
    %c0_102 = arith.constant 0 : index
    %c0_103 = arith.constant 0 : index
    %c0_104 = arith.constant 0 : index
    %85 = vector.load %arg6[%c0_101, %c0_102, %c0_103, %c0_104] : memref<1x8x8x128xf32, #tpu.memory_space<vmem>>, vector<1x8x8x128xf32>
    tpu.vector_store %arg6[%c0_101, %c0_102, %c0_103, %c0_104], %84 {strides = array<i32>} : memref<1x8x8x128xf32, #tpu.memory_space<vmem>>, vector<1x8x8x128xf32>,
    return
  }
  func.func @transform_0(%arg0: i32) -> (i32, i32, i32, i32) {
    %c0_i32 = arith.constant 0 : i32
    %c0_i32_0 = arith.constant 0 : i32
    %c0_i32_1 = arith.constant 0 : i32
    %c0_i32_2 = arith.constant 0 : i32
    return %arg0, %c0_i32, %c0_i32_0, %c0_i32_1 : i32, i32, i32, i32
  }
  func.func @transform_1(%arg0: i32) -> (i32, i32) {
    %c0_i32 = arith.constant 0 : i32
    %c0_i32_0 = arith.constant 0 : i32
    %c0_i32_1 = arith.constant 0 : i32
    return %c0_i32, %c0_i32_0 : i32, i32
  }
  func.func @transform_2(%arg0: i32) -> (i32, i32, i32) {
    %c0_i32 = arith.constant 0 : i32
    %c0_i32_0 = arith.constant 0 : i32
    %c0_i32_1 = arith.constant 0 : i32
    %c0_i32_2 = arith.constant 0 : i32
    return %c0_i32, %c0_i32_0, %c0_i32_1 : i32, i32, i32
  }
  func.func @transform_3(%arg0: i32) -> (i32, i32) {
    %c0_i32 = arith.constant 0 : i32
    %c0_i32_0 = arith.constant 0 : i32
    %c0_i32_1 = arith.constant 0 : i32
    return %c0_i32, %c0_i32_0 : i32, i32
  }
  func.func @transform_4(%arg0: i32) -> (i32, i32, i32) {
    %c0_i32 = arith.constant 0 : i32
    %c0_i32_0 = arith.constant 0 : i32
    %c0_i32_1 = arith.constant 0 : i32
    %c0_i32_2 = arith.constant 0 : i32
    return %c0_i32, %c0_i32_0, %c0_i32_1 : i32, i32, i32
  }
  func.func @transform_5(%arg0: i32) -> (i32, i32, i32, i32) {
    %c0_i32 = arith.constant 0 : i32
    %c0_i32_0 = arith.constant 0 : i32
    %c0_i32_1 = arith.constant 0 : i32
    %c0_i32_2 = arith.constant 0 : i32
    return %arg0, %c0_i32, %c0_i32_0, %c0_i32_1 : i32, i32, i32, i32
  }
}

</mosaic_0001>

<bundles_post_ra>
// kernel: tpu_custom_call.1
= control target key start
LH: loop header
LB: loop body
LE: loop exit
PB: predicated region body
PF: predicated region fallthrough
CT: control target
= control target key end

     0   :  { %10 = vsyncpa [#allocation4], 0  ;;  %s4002_s0 = inlined_call_operand.hbm [shape: f32[2,8,8,128], index: 0, kind: input, shape index: {}]   ;;  %s4003_s1 = inlined_call_operand.hbm [shape: f32[128,128], index: 1, kind: input, shape index: {}]   ;;  %s4004_s2 = inlined_call_operand.hbm [shape: f32[9,128,128], index: 2, kind: input, shape index: {}]   ;;  %s4005_s3 = inlined_call_operand.hbm [shape: f32[128,128], index: 3, kind: input, shape index: {}]   ;;  %s4006_s4 = inlined_call_operand.vmem [shape: f32[3,1,128], index: 4, kind: input, shape index: {}]   ;;  %s4007_s5 = inlined_call_operand.hbm [shape: f32[2,8,8,128], index: 5, kind: output, shape index: {}]  }
   0x1   :  { %12 = vsyncpa [#allocation4 + $0x1], 0 }
   0x2   :  { %13 = vsyncpa [#allocation7], 0 }
   0x3   :  { %14 = vsyncpa [#allocation10], 0 }
   0x4   :  { %15 = vsyncpa [#allocation5], 0 }
   0x5   :  { %17 = vsyncpa [#allocation5 + $0x1], 0  ;;  %s3517_s18 = smov 0   ;;  %s3519_s19 = smov 0  }
   0x6   :  { %s3521_s20 = smov 0   ;;  %s3523_s21 = smov 0  }
   0x7 LB: > { %s3538_s22 = sadd.s32 4294967295, %s3475_s21   ;;  %s1966_s23 = sadd.s32 4294967294, %s3475_s21   ;;  %s3475_s21 = sphi %s3523_s21, %s4030_s21   ;;  %s3471_s20 = sphi %s3521_s20, %s4029_s20   ;;  %s3467_s19 = sphi %s3519_s19, %s4028_s19   ;;  %s3463_s18 = sphi %s3517_s18, %s4027_s18  }
   0x8   : > { %p43_p0 = scmp.ne.s32.totalorder %s3467_s19, %s3463_s18  ;;  %p4008_p1 = scmp.eq.s32.totalorder %s3538_s22, 0 }
   0x9   : > { %p157_p3 = scmp.eq.s32.totalorder %s1966_s23, 1  ;;  %p1967_p5 = scmp.ge.s32.totalorder %s3475_s21, 1 }
   0xa   : > { %p3547_p4 = por %p4008_p1, %p43_p0  ;;  %p164_p7 = scmp.lt.s32.totalorder %s3475_s21, 3 }
   0xb   : > { %p3552_p6 = por %p157_p3, %p43_p0  ;;  %s3477_s27 = smov [#allocation6]  }
   0xc   : > { %s4011_s24 = scalar_select %p3547_p4, 1, 0 }
   0xd   : > { %s4012_s25 = scalar_select %p3552_p6, 1, 0 }
   0xe   : > { %p3557_p8 = pnand %p1967_p5, %p164_p7  ;;  %s176_s28 = sshll.u32 %s3477_s27, 4  ;;  %s3561_s28 = int_to_ptr.vmem [resolvable:$true] %s176_s28 }
   0xf   : > { %s3478_s30 = smov [#allocation8]   ;;  %s3479_s7 = smov [#allocation9]  }
  0x10   : > { %s4013_s26 = scalar_select %p3557_p8, 1, 0 }
  0x11   : > { %p3213_p9 = pneg %p3557_p8  ;;  %s189_s6 = sshll.u32 %s3478_s30, 4  ;;  %s3572_s6 = int_to_ptr.vmem [resolvable:$true] %s189_s6 }
  0x12   : > { %s3574_s8 = sshll.u32 %s3479_s7, 4  ;;  %s3287_s11 = scalar_lea.hbm %s4003_s1, 2048  ;;  %s203_s8 = int_to_ptr.vmem [resolvable:$true] %s3574_s8 }
  0x13   : > { %p3568_p11 = pnand %p3213_p9, %p4008_p1  ;;  %p3288_p12 = scmp.ne.s32.totalorder %s4003_s1, %s3287_s11 }
  0x14   : > { %p3294_p5 = scmp.lt.u32.totalorder %s3287_s11, %s4003_s1 }
  0x15   : > { %p3584_p13 = pneg %p3568_p11 }
  0x17   : > { %p3290_p0 = pnand %p3584_p13, %p3288_p12 }
  0x19   : > { %p3291_p3 = pneg %p3290_p0 }
  0x1b   : > { %p3296_p7 = pnand %p3294_p5, %p3291_p3 }
  0x1d   : > { %3299 = shalt.err (!%p3296_p7)
}
  0x1e   : > { %s3300_s17 = scalar_lea.vmem %s3561_s28, 2048  ;;  %p3308_p2 = scmp.lt.s32.totalorder %s3561_s28, %s3561_s28 }
  0x1f   : > { %p3301_p9 = scmp.ne.s32.totalorder %s3561_s28, %s3300_s17  ;;  %p3309_p6 = scmp.lt.s32.totalorder %s3300_s17, %s3300_s17 }
  0x21   : > { %p3303_p10 = pnand %p3301_p9, %p3584_p13  ;;  %p3310_p12 = por %p3309_p6, %p3308_p2 }
  0x23   : > { %p3304_p1 = pneg %p3303_p10 }
  0x25   : > { %p3311_p0 = pnand %p3310_p12, %p3304_p1 }
  0x27   : > { %3314 = shalt.err (!%p3311_p0)
}
  0x28   : > { %s3480_s23 = smov 128   ;;  %s3481_s27 = smov 8  }
  0x29   : > { %3216 = dma.hbm_to_vmem [thread:$0]  (!%p3568_p11), %s4003_s1, 2048, %s3561_s28, [#allocation7], %s3480_s23, %s3480_s23, %s3481_s27  }
  0x2a   : > { %s3315_s11 = scalar_lea.hbm %s4004_s2, 18432 }
  0x2b   : > { %p3316_p1 = scmp.ne.s32.totalorder %s4004_s2, %s3315_s11  ;;  %p3322_p10 = scmp.lt.u32.totalorder %s3315_s11, %s4004_s2 }
  0x2d   : > { %p3318_p2 = pnand %p3316_p1, %p3584_p13 }
  0x2f   : > { %p3319_p6 = pneg %p3318_p2 }
  0x31   : > { %p3324_p3 = pnand %p3322_p10, %p3319_p6 }
  0x33   : > { %3327 = shalt.err (!%p3324_p3)
}
  0x34   : > { %s3328_s28 = scalar_lea.vmem %s3572_s6, 18432  ;;  %p3336_p12 = scmp.lt.s32.totalorder %s3572_s6, %s3572_s6 }
  0x35   : > { %p3329_p5 = scmp.ne.s32.totalorder %s3572_s6, %s3328_s28  ;;  %p3337_p0 = scmp.lt.s32.totalorder %s3328_s28, %s3328_s28 }
  0x37   : > { %p3331_p7 = pnand %p3329_p5, %p3584_p13  ;;  %p3338_p1 = por %p3337_p0, %p3336_p12 }
  0x39   : > { %p3332_p9 = pneg %p3331_p7 }
  0x3b   : > { %p3339_p2 = pnand %p3338_p1, %p3332_p9 }
  0x3d   : > { %3342 = shalt.err (!%p3339_p2)
}
  0x3e   : > { %3219 = dma.hbm_to_vmem [thread:$0]  (!%p3568_p11), %s4004_s2, 18432, %s3572_s6, [#allocation7], %s3480_s23, %s3480_s23, %s3481_s27  }
  0x3f   : > { %s3343_s10 = scalar_lea.hbm %s4005_s3, 2048 }
  0x40   : > { %p3344_p6 = scmp.ne.s32.totalorder %s4005_s3, %s3343_s10  ;;  %p3350_p5 = scmp.lt.u32.totalorder %s3343_s10, %s4005_s3 }
  0x42   : > { %p3346_p10 = pnand %p3344_p6, %p3584_p13 }
  0x44   : > { %p3347_p3 = pneg %p3346_p10 }
  0x46   : > { %p3352_p7 = pnand %p3350_p5, %p3347_p3 }
  0x48   : > { %3355 = shalt.err (!%p3352_p7)
}
  0x49   : > { %s3356_s16 = scalar_lea.vmem %s203_s8, 2048  ;;  %p3364_p1 = scmp.lt.s32.totalorder %s203_s8, %s203_s8 }
  0x4a   : > { %p3357_p9 = scmp.ne.s32.totalorder %s203_s8, %s3356_s16  ;;  %p3365_p2 = scmp.lt.s32.totalorder %s3356_s16, %s3356_s16 }
  0x4c   : > { %p3359_p12 = pnand %p3357_p9, %p3584_p13  ;;  %p3366_p4 = por %p3365_p2, %p3364_p1 }
  0x4e   : > { %p3360_p0 = pneg %p3359_p12 }
  0x50   : > { %p3367_p8 = pnand %p3366_p4, %p3360_p0 }
  0x52   : > { %3370 = shalt.err (!%p3367_p8)
}
  0x53   : > { %3222 = dma.hbm_to_vmem [thread:$0]  (!%p3568_p11), %s4005_s3, 2048, %s203_s8, [#allocation10], %s3480_s23, %s3480_s23, %s3481_s27  }
  0x54   : > { %s3657_s14 = sadd.s32 1, %s3475_s21   ;;  %s30_s17 = sadd.s32 1, %s3471_s20 }
  0x55   : > { %s27_s29 = ssub.s32 %s3475_s21, %s3657_s14  ;;  %p37_p8 = scmp.ne.s32.totalorder %s3471_s20, %s3467_s19 }
  0x56   : > { %p28_p4 = scmp.eq.s32.totalorder %s27_s29, 0  ;;  %p38_p13 = scmp.eq.s32.totalorder %s3475_s21, 0 }
  0x57   : > { %p3234_p6 = scmp.lt.s32.totalorder %s3475_s21, 2  ;;  %p4016_p3 = scmp.eq.s32.totalorder %s3538_s22, 1 }
  0x58   : > { %s3667_s30 = scalar_select %p28_p4, %s3471_s20, %s30_s17  }
  0x59   : > { %p39_p10 = por %p38_p13, %p37_p8  ;;  %p3671_p5 = por %p4016_p3, %p37_p8 }
  0x5a   : > { %s219_s9 = sand.u32 1, %s3471_s20   ;;  %s1991_s10 = sshll.u32 %s3475_s21, 10 }
  0x5b   : > { %s1972_s8 = sshll.u32 %s219_s9, 6  ;;  %s3680_s13 = scalar_lea.hbm %s4002_s0, %s1991_s10 }
  0x5c   : > { %s223_s15 = scalar_lea.vmem [#allocation3], %s1972_s8  ;;  %p3682_p11 = pnand %p3234_p6, %p39_p10 }
  0x5d   : > { %s230_s16 = sshll.u32 %s223_s15, 4  ;;  %s3688_s28 = scalar_lea.sflag [#allocation4], %s219_s9  ;;  %s3686_s16 = int_to_ptr.vmem [resolvable:$true] %s230_s16 }
  0x5e   : > { %s3371_s29 = scalar_lea.hbm %s3680_s13, 1024  ;;  %p3373_p9 = pneg %p3682_p11 }
  0x5f   : > { %p3372_p7 = scmp.ne.s32.totalorder %s3680_s13, %s3371_s29  ;;  %s3376_s8 = scalar_lea.hbm %s4002_s0, 2048 }
  0x60   : > { %p3377_p1 = scmp.lt.u32.totalorder %s3680_s13, %s4002_s0  ;;  %p3378_p2 = scmp.lt.u32.totalorder %s3376_s8, %s3371_s29 }
  0x61   : > { %p3374_p12 = pnand %p3373_p9, %p3372_p7  ;;  %p3380_p8 = scmp.lt.u32.totalorder %s3371_s29, %s3680_s13 }
  0x62   : > { %p3379_p4 = por %p3378_p2, %p3377_p1 }
  0x63   : > { %p3375_p0 = pneg %p3374_p12 }
  0x64   : > { %p3381_p13 = por %p3380_p8, %p3379_p4 }
  0x66   : > { %p3382_p6 = pnand %p3381_p13, %p3375_p0 }
  0x68   : > { %3385 = shalt.err (!%p3382_p6)
}
  0x69   : > { %s3386_s9 = scalar_lea.vmem %s3686_s16, 1024  ;;  %s3482_s15 = smov [#allocation3]  }
  0x6a   : > { %p3387_p10 = scmp.ne.s32.totalorder %s3686_s16, %s3386_s9  ;;  %s3391_s17 = sshll.u32 %s3482_s15, 4  ;;  %s3392_s17 = int_to_ptr.vmem [resolvable:$false] %s3391_s17 }
  0x6b   : > { %s3393_s10 = scalar_lea.vmem %s3392_s17, 2048  ;;  %p3394_p12 = scmp.lt.s32.totalorder %s3686_s16, %s3392_s17 }
  0x6c   : > { %p3389_p3 = pnand %p3387_p10, %p3373_p9  ;;  %p3395_p1 = scmp.lt.s32.totalorder %s3393_s10, %s3386_s9 }
  0x6e   : > { %p3390_p7 = pneg %p3389_p3  ;;  %p3396_p2 = por %p3395_p1, %p3394_p12 }
  0x70   : > { %p3397_p4 = pnand %p3396_p2, %p3390_p7 }
  0x72   : > { %3400 = shalt.err (!%p3397_p4)
}
  0x73   : > { %3226 = dma.hbm_to_vmem [thread:$0]  (!%p3682_p11), %s3680_s13, 1024, %s3686_s16, %s3688_s28, %s3480_s23, %s3480_s23, %s3481_s27  }
  0x74   : > { %p4019_p9 = scmp.ne.s32.totalorder %s4013_s26, 0 }
  0x75   : > { %s3722_s29 = sand.u32 (!%p4019_p9), 1, %s3467_s19   ;;  %p4020_p0 = scmp.ne.s32.totalorder (!%p4019_p9), %s4011_s24, 0 }
  0x76   : > { %242 = sbr.rel (%p4019_p9) target bundleno = 791 (0x317), region = 40  ;;  %s1976_s8 = sshll.u32 (!%p4019_p9), %s3722_s29, 6 }
  0x77   : > { %s245_s11 = scalar_lea.sflag (!%p4019_p9), [#allocation4], %s3722_s29  ;;  %s3728_s6 = scalar_lea.vmem (!%p4019_p9), [#allocation3], %s1976_s8 }
  0x7d   : > { %3446 = dma.done.wait (%p4020_p0), %s245_s11, 1024  }
  0x7e   : > { %3448 = vsyncadd (%p4020_p0), %s245_s11, 4294966272  ;;  %p4021_p11 = scmp.eq.s32.totalorder %s3538_s22, 0 }
  0x80   : > { %3450 = dma.done.wait (%p4021_p11), [#allocation7], 20480   ;;  %p4022_p8 = pmov %p4021_p11 }
  0x82   : > { %3452 = vsyncadd (%p4022_p8), [#allocation7], 4294946816  ;;  %p4023_p13 = pmov %p4022_p8 }
  0x83   : > { %p4024_p6 = pmov %p4022_p8 }
  0x84   : > { %3454 = dma.done.wait (%p4023_p13), [#allocation10], 2048  }
  0x85   : > { %3456 = vsyncadd (%p4024_p6), [#allocation10], 4294965248  ;;  %v295_v0 = vld [vmem:[#allocation6] sm:$0xff]  ;;  %v296_v1 = vld [vmem:[#allocation6 + $0x8] sm:$0xff]  ;;  %s3941_s28 = scalar_lea.vmem [#allocation11], %s1976_s8  ;;  %s1992_s9 = sshll.u32 %s3538_s22, 10 }
  0x86   : > { %v297_v2 = vld [vmem:[#allocation6 + $0x10] sm:$0xff]  ;;  %v2741_v3 = vpack.c.bf16 %v296_v1, %v295_v0  ;;  %v298_v4 = vld [vmem:[#allocation6 + $0x18] sm:$0xff]  ;;  %v299_v6 = vld [vmem:[#allocation6 + $0x20] sm:$0xff]  ;;  %s1864_s12 = sshll.u32 %s3941_s28, 4  ;;  %s3956_s10 = scalar_lea.hbm %s4007_s5, %s1992_s9  ;;  %s3950_s12 = int_to_ptr.vmem [resolvable:$true] %s1864_s12 }
  0x87   : > { %v2745_v5 = vpack.c.bf16 %v298_v4, %v297_v2  ;;  %v300_v7 = vld [vmem:[#allocation6 + $0x28] sm:$0xff]  ;;  %v287_v9 = vld [vmem:[%s3728_s6] sm:$0xff]  ;;  %v301_v10 = vld [vmem:[#allocation6 + $0x30] sm:$0xff]  ;;  %s1851_s22 = scalar_lea.sflag [#allocation5], %s3722_s29  ;;  %s3401_s8 = scalar_lea.vmem %s3950_s12, 1024 }
  0x88   : > { %2742 = vmatprep.subr.bf16.mxu0 %v2741_v3  ;;  %v2749_v8 = vpack.c.bf16 %v300_v7, %v299_v6  ;;  %v302_v11 = vld [vmem:[#allocation6 + $0x38] sm:$0xff]  ;;  %2289 = vmatprep.mubr.f32.mxu0 %v287_v9  ;;  %v999_v12 = vld [vmem:[#allocation8 + $0x180] sm:$0xff]  ;;  %v1000_v15 = vld [vmem:[#allocation8 + $0x188] sm:$0xff]  ;;  %p3402_p10 = scmp.ne.s32.totalorder %s3950_s12, %s3401_s8  ;;  %s3484_s11 = smov [#allocation11]  }
  0x89   : > { %2744 = vmatpush3.bf16.msra.mxu0 %v2741_v3  ;;  %v2753_v13 = vpack.c.bf16 %v302_v11, %v301_v10  ;;  %v303_v14 = vld [vmem:[#allocation6 + $0x40] sm:$0xff]  ;;  %v304_v16 = vld [vmem:[#allocation6 + $0x48] sm:$0xff]  ;;  %v2901_v17 = vpack.c.bf16 %v1000_v15, %v999_v12  ;;  %v1001_v18 = vld [vmem:[#allocation8 + $0x190] sm:$0xff]  ;;  %v3483_v10 = vmov 0.0  }
  0x8a   : > { %2746 = vmatprep.subr.bf16.mxu0 %v2745_v5  ;;  %v1002_v19 = vld [vmem:[#allocation8 + $0x198] sm:$0xff]  ;;  %v1003_v21 = vld [vmem:[#allocation8 + $0x1a0] sm:$0xff]  ;;  %v1004_v22 = vld [vmem:[#allocation8 + $0x1a8] sm:$0xff]  ;;  %v2757_v23 = vpack.c.bf16 %v304_v16, %v303_v14  ;;  %431 = vst [vmem:[#allocation2] sm:$0xff] %v3483_v10  ;;  %p3403_p3 = pnand %p3402_p10, %p3671_p5 }
  0x8b   : > { %v2905_v20 = vpack.c.bf16 %v1002_v19, %v1001_v18  ;;  %2902 = vmatprep.subr.bf16.mxu1 %v2901_v17  ;;  %v305_v24 = vld [vmem:[#allocation6 + $0x50] sm:$0xff]  ;;  %v306_v25 = vld [vmem:[#allocation6 + $0x58] sm:$0xff]  ;;  %v2909_v26 = vpack.c.bf16 %v1004_v22, %v1003_v21  ;;  %v307_v30 = vld [vmem:[#allocation6 + $0x60] sm:$0xff]  ;;  %432 = vst [vmem:[#allocation2 + $0x8] sm:$0xff] %v3483_v10 }
  0x8c   : > { %2904 = vmatpush3.bf16.msra.mxu1 %v2901_v17  ;;  %v1005_v27 = vld [vmem:[#allocation8 + $0x1b0] sm:$0xff]  ;;  %v1006_v28 = vld [vmem:[#allocation8 + $0x1b8] sm:$0xff]  ;;  %v2761_v29 = vpack.c.bf16 %v306_v25, %v305_v24  ;;  %v308_v31 = vld [vmem:[#allocation6 + $0x68] sm:$0xff]  ;;  %433 = vst [vmem:[#allocation2 + $0x10] sm:$0xff] %v3483_v10  ;;  %p3404_p7 = pneg %p3403_p3 }
  0x8d   : > { %2748 = vmatpush3.bf16.msra.mxu0 %v2745_v5  ;;  %2906 = vmatprep.subr.bf16.mxu1 %v2905_v20  ;;  %v2913_v32 = vpack.c.bf16 %v1006_v28, %v1005_v27  ;;  %v1007_v33 = vld [vmem:[#allocation8 + $0x1c0] sm:$0xff]  ;;  %v1008_v34 = vld [vmem:[#allocation8 + $0x1c8] sm:$0xff]  ;;  %v2765_v35 = vpack.c.bf16 %v308_v31, %v307_v30  ;;  %v309_v36 = vld [vmem:[#allocation6 + $0x70] sm:$0xff]  ;;  %435 = vst [vmem:[#allocation2 + $0xd8] sm:$0xff] %v3483_v10 }
  0x8e   : > { %2750 = vmatprep.subr.bf16.mxu0 %v2749_v8  ;;  %v310_v37 = vld [vmem:[#allocation6 + $0x78] sm:$0xff]  ;;  %v2917_v38 = vpack.c.bf16 %v1008_v34, %v1007_v33  ;;  %v488_v40 = vld [vmem:[#allocation8] sm:$0xff]  ;;  %v489_v41 = vld [vmem:[#allocation8 + $0x8] sm:$0xff]  ;;  %436 = vst [vmem:[#allocation2 + $0xe0] sm:$0xff] %v3483_v10 }
  0x8f   : > { %v2769_v39 = vpack.c.bf16 %v310_v37, %v309_v36  ;;  %v2773_v42 = vpack.c.bf16 %v489_v41, %v488_v40  ;;  %v490_v43 = vld [vmem:[#allocation8 + $0x10] sm:$0xff]  ;;  %v491_v44 = vld [vmem:[#allocation8 + $0x18] sm:$0xff]  ;;  %v288_v45 = vld [vmem:[%s3728_s6 + $0x8] sm:$0xff]  ;;  %437 = vst [vmem:[#allocation2 + $0xe8] sm:$0xff] %v3483_v10 }
  0x90   : > { %2908 = vmatpush3.bf16.msra.mxu1 %v2905_v20  ;;  %v289_v46 = vld [vmem:[%s3728_s6 + $0x10] sm:$0xff]  ;;  %v2777_v47 = vpack.c.bf16 %v491_v44, %v490_v43  ;;  %v492_v48 = vld [vmem:[#allocation8 + $0x20] sm:$0xff]  ;;  %v493_v49 = vld [vmem:[#allocation8 + $0x28] sm:$0xff]  ;;  %439 = vst [vmem:[#allocation2 + $0x18] sm:$0xff] %v3483_v10 }
  0x91   : > { %2752 = vmatpush3.bf16.msra.mxu0 %v2749_v8  ;;  %2910 = vmatprep.subr.bf16.mxu1 %v2909_v26  ;;  %v290_v50 = vld [vmem:[%s3728_s6 + $0x18] sm:$0xff]  ;;  %v291_v51 = vld [vmem:[%s3728_s6 + $0x20] sm:$0xff]  ;;  %v2781_v52 = vpack.c.bf16 %v493_v49, %v492_v48  ;;  %v494_v53 = vld [vmem:[#allocation8 + $0x30] sm:$0xff]  ;;  %440 = vst [vmem:[#allocation2 + $0x30] sm:$0xff] %v3483_v10 }
  0x92   : > { %2754 = vmatprep.subr.bf16.mxu0 %v2753_v13  ;;  %v495_v54 = vld [vmem:[#allocation8 + $0x38] sm:$0xff]  ;;  %v292_v55 = vld [vmem:[%s3728_s6 + $0x28] sm:$0xff]  ;;  %v293_v56 = vld [vmem:[%s3728_s6 + $0x30] sm:$0xff]  ;;  %441 = vst [vmem:[#allocation2 + $0x48] sm:$0xff] %v3483_v10 }
  0x93   : > { %v2785_v57 = vpack.c.bf16 %v495_v54, %v494_v53  ;;  %v496_v58 = vld [vmem:[#allocation8 + $0x40] sm:$0xff]  ;;  %v497_v59 = vld [vmem:[#allocation8 + $0x48] sm:$0xff]  ;;  %v294_v60 = vld [vmem:[%s3728_s6 + $0x38] sm:$0xff]  ;;  %442 = vst [vmem:[#allocation2 + $0x60] sm:$0xff] %v3483_v10 }
  0x94   : > { %2912 = vmatpush3.bf16.msra.mxu1 %v2909_v26  ;;  %v2789_v61 = vpack.c.bf16 %v497_v59, %v496_v58  ;;  %v498_v62 = vld [vmem:[#allocation8 + $0x50] sm:$0xff]  ;;  %v499_v63 = vld [vmem:[#allocation8 + $0x58] sm:$0xff]  ;;  %v500_v4 = vld [vmem:[#allocation8 + $0x60] sm:$0xff]  ;;  %443 = vst [vmem:[#allocation2 + $0x78] sm:$0xff] %v3483_v10 }
  0x95   : > { %2756 = vmatpush3.bf16.msra.mxu0 %v2753_v13  ;;  %2914 = vmatprep.subr.bf16.mxu1 %v2913_v32  ;;  %v2793_v0 = vpack.c.bf16 %v499_v63, %v498_v62  ;;  %v1009_v1 = vld [vmem:[#allocation8 + $0x1d0] sm:$0xff]  ;;  %v1010_v2 = vld [vmem:[#allocation8 + $0x1d8] sm:$0xff]  ;;  %v501_v5 = vld [vmem:[#allocation8 + $0x68] sm:$0xff]  ;;  %444 = vst [vmem:[#allocation2 + $0x90] sm:$0xff] %v3483_v10 }
  0x96   : > { %2758 = vmatprep.subr.bf16.mxu0 %v2757_v23  ;;  %v2921_v3 = vpack.c.bf16 %v1010_v2, %v1009_v1  ;;  %v2797_v6 = vpack.c.bf16 %v501_v5, %v500_v4  ;;  %v1011_v7 = vld [vmem:[#allocation8 + $0x1e0] sm:$0xff]  ;;  %v1012_v8 = vld [vmem:[#allocation8 + $0x1e8] sm:$0xff]  ;;  %445 = vst [vmem:[#allocation2 + $0xa8] sm:$0xff] %v3483_v10  ;;  %446 = vst [vmem:[#allocation2 + $0xc0] sm:$0xff] %v3483_v10 }
  0x97   : > { %v2925_v9 = vpack.c.bf16 %v1012_v8, %v1011_v7  ;;  %447 = vst [vmem:[#allocation2 + $0x28] sm:$0xff] %v3483_v10  ;;  %448 = vst [vmem:[#allocation2 + $0x40] sm:$0xff] %v3483_v10  ;;  %v502_v11 = vld [vmem:[#allocation8 + $0x70] sm:$0xff]  ;;  %v503_v12 = vld [vmem:[#allocation8 + $0x78] sm:$0xff] }
  0x98   : > { %2916 = vmatpush3.bf16.msra.mxu1 %v2913_v32  ;;  %449 = vst [vmem:[#allocation2 + $0x58] sm:$0xff] %v3483_v10  ;;  %450 = vst [vmem:[#allocation2 + $0x70] sm:$0xff] %v3483_v10  ;;  %v2801_v13 = vpack.c.bf16 %v503_v12, %v502_v11  ;;  %v1013_v14 = vld [vmem:[#allocation8 + $0x1f0] sm:$0xff]  ;;  %v1014_v15 = vld [vmem:[#allocation8 + $0x1f8] sm:$0xff] }
  0x99   : > { %2760 = vmatpush3.bf16.msra.mxu0 %v2757_v23  ;;  %2918 = vmatprep.subr.bf16.mxu1 %v2917_v38  ;;  %451 = vst [vmem:[#allocation2 + $0x88] sm:$0xff] %v3483_v10  ;;  %452 = vst [vmem:[#allocation2 + $0xa0] sm:$0xff] %v3483_v10  ;;  %v2929_v16 = vpack.c.bf16 %v1014_v15, %v1013_v14  ;;  %v464_v17 = vld [vmem:[#allocation8 + $0x200] sm:$0xff]  ;;  %v465_v18 = vld [vmem:[#allocation8 + $0x208] sm:$0xff] }
  0x9a   : > { %2762 = vmatprep.subr.bf16.mxu0 %v2761_v29  ;;  %453 = vst [vmem:[#allocation2 + $0xb8] sm:$0xff] %v3483_v10  ;;  %454 = vst [vmem:[#allocation2 + $0xd0] sm:$0xff] %v3483_v10  ;;  %v2805_v19 = vpack.c.bf16 %v465_v18, %v464_v17  ;;  %v480_v20 = vld [vmem:[#allocation2 + $0x7] sm:$0xff]  ;;  %v1137_v21 = vld [vmem:[#allocation8 + $0x280] sm:$0xff] }
  0x9b   : > { %v1138_v22 = vld [vmem:[#allocation8 + $0x288] sm:$0xff]  ;;  %v1981_v24 = vld [vmem:[%s4006_s4] ss:$0 sm:$0xff]  ;;  %v467_v41 = vld [vmem:[#allocation8 + $0x218] sm:$0xff] }
  0x9c   : > { %2920 = vmatpush3.bf16.msra.mxu1 %v2917_v38  ;;  %v2933_v23 = vpack.c.bf16 %v1138_v22, %v1137_v21  ;;  %v466_v40 = vld [vmem:[#allocation8 + $0x210] sm:$0xff]  ;;  %v1140_v48 = vld [vmem:[#allocation8 + $0x298] sm:$0xff]  ;;  %v468_v54 = vld [vmem:[#allocation8 + $0x220] sm:$0xff] }
  0x9d   : > { %2764 = vmatpush3.bf16.msra.mxu0 %v2761_v29  ;;  %2922 = vmatprep.subr.bf16.mxu1 %v2921_v3  ;;  %v1141_v59 = vld [vmem:[#allocation8 + $0x2a0] sm:$0xff]  ;;  %v471_v1 = vld [vmem:[#allocation8 + $0x238] sm:$0xff]  ;;  %v473_v11 = vld [vmem:[#allocation8 + $0x248] sm:$0xff] }
  0x9e   : > { %2766 = vmatprep.subr.bf16.mxu0 %v2765_v35  ;;  %v1144_v4 = vld [vmem:[#allocation8 + $0x2b8] sm:$0xff]  ;;  %v472_v8 = vld [vmem:[#allocation8 + $0x240] sm:$0xff]  ;;  %v474_v14 = vld [vmem:[#allocation8 + $0x250] sm:$0xff] }
  0x9f   : > { %v1145_v12 = vld [vmem:[#allocation8 + $0x2c0] sm:$0xff]  ;;  %v475_v17 = vld [vmem:[#allocation8 + $0x258] sm:$0xff]  ;;  %v2821_v18 = vpack.c.bf16 %v473_v11, %v472_v8 }
  0xa0   : > { %2924 = vmatpush3.bf16.msra.mxu1 %v2921_v3  ;;  %v1143_v3 = vld [vmem:[#allocation8 + $0x2b0] sm:$0xff]  ;;  %v1148_v21 = vld [vmem:[#allocation8 + $0x2d8] sm:$0xff] }
  0xa1   : > { %2768 = vmatpush3.bf16.msra.mxu0 %v2765_v35  ;;  %2926 = vmatprep.subr.bf16.mxu1 %v2925_v9  ;;  %v1283_v11 = vld [vmem:[#allocation8 + $0x338] sm:$0xff] }
  0xa2   : > { %2770 = vmatprep.subr.bf16.mxu0 %v2769_v39 }
  0xa4   : > { %2928 = vmatpush3.bf16.msra.mxu1 %v2925_v9  ;;  %v2945_v9 = vpack.c.bf16 %v1144_v4, %v1143_v3  ;;  %v729_v3 = vld [vmem:[#allocation8 + $0xb0] sm:$0xff]  ;;  %v730_v4 = vld [vmem:[#allocation8 + $0xb8] sm:$0xff] }
  0xa5   : > { %2772 = vmatpush3.bf16.msra.mxu0 %v2769_v39  ;;  %2930 = vmatprep.subr.bf16.mxu1 %v2929_v16 }
  0xa6   : > { %2774 = vmatprep.subr.bf16.mxu0 %v2773_v42 }
  0xa8   : > { %2290 = vmatmul.mubr.f32.vlgmr.msra.gmra.mrb[0].mxu0 %v288_v45  ;;  %2932 = vmatpush3.bf16.msra.mxu1 %v2929_v16 }
  0xa9   : > { %2292 = vmatprep.mubr.f32.mxu0 %v289_v46  ;;  %2776 = vmatpush3.bf16.msra.mxu0 %v2773_v42  ;;  %v2809_v46 = vpack.c.bf16 %v467_v41, %v466_v40  ;;  %v723_v40 = vld [vmem:[#allocation8 + $0x80] sm:$0xff]  ;;  %v724_v41 = vld [vmem:[#allocation8 + $0x88] sm:$0xff] }
  0xaa   : > { %2778 = vmatprep.subr.bf16.mxu0 %v2777_v47  ;;  %2934 = vmatprep.subr.bf16.mxu1 %v2933_v23 }
  0xac   : > { %2293 = vmatmul.mubr.f32.gmra.mrb[2].mxu0 %v290_v50 }
  0xad   : > { %2295 = vmatprep.mubr.f32.mxu0 %v291_v51  ;;  %2780 = vmatpush3.bf16.msra.mxu0 %v2777_v47  ;;  %v1139_v47 = vld [vmem:[#allocation8 + $0x290] sm:$0xff] }
  0xae   : > { %2782 = vmatprep.subr.bf16.mxu0 %v2781_v52 }
  0xb0   : > { %2296 = vmatmul.mubr.f32.gmra.mrb[4].mxu0 %v292_v55  ;;  %v469_v55 = vld [vmem:[#allocation8 + $0x228] sm:$0xff] }
  0xb1   : > { %2298 = vmatprep.mubr.f32.mxu0 %v293_v56  ;;  %2784 = vmatpush3.bf16.msra.mxu0 %v2781_v52  ;;  %v2813_v63 = vpack.c.bf16 %v469_v55, %v468_v54  ;;  %v727_v55 = vld [vmem:[#allocation8 + $0xa0] sm:$0xff] }
  0xb2   : > { %2786 = vmatprep.subr.bf16.mxu0 %v2785_v57 }
  0xb4   : > { %2299 = vmatmul.mubr.f32.gmra.mrb[6].mxu0 %v294_v60  ;;  %v1142_v60 = vld [vmem:[#allocation8 + $0x2a8] sm:$0xff] }
  0xb5   : > { %2788 = vmatpush3.bf16.msra.mxu0 %v2785_v57  ;;  %2333 = vmatprep.mubr.f32.mxu0 %v480_v20  ;;  %v2937_v57 = vpack.c.bf16 %v1140_v48, %v1139_v47  ;;  %v2941_v2 = vpack.c.bf16 %v1142_v60, %v1141_v59  ;;  %v1147_v20 = vld [vmem:[#allocation8 + $0x2d0] sm:$0xff]  ;;  %v2837_v47 = vpack.c.bf16 %v724_v41, %v723_v40  ;;  %v1289_v40 = vld [vmem:[#allocation8 + $0x368] sm:$0xff] }
  0xb6   : > { %2790 = vmatprep.subr.bf16.mxu0 %v2789_v61  ;;  %v725_v48 = vld [vmem:[#allocation8 + $0x90] sm:$0xff] }
  0xb9   : > { %2792 = vmatpush3.bf16.msra.mxu0 %v2789_v61 }
  0xba   : > { %2794 = vmatprep.subr.bf16.mxu0 %v2793_v0 }
  0xbd   : > { %2796 = vmatpush3.bf16.msra.mxu0 %v2793_v0  ;;  %v470_v0 = vld [vmem:[#allocation8 + $0x230] sm:$0xff] }
  0xbe   : > { %2798 = vmatprep.subr.bf16.mxu0 %v2797_v6  ;;  %v2817_v7 = vpack.c.bf16 %v471_v1, %v470_v0  ;;  %v1281_v0 = vld [vmem:[#allocation8 + $0x328] sm:$0xff] }
  0xc1   : > { %2800 = vmatpush3.bf16.msra.mxu0 %v2797_v6 }
  0xc2   : > { %2802 = vmatprep.subr.bf16.mxu0 %v2801_v13 }
  0xc5   : > { %2804 = vmatpush3.bf16.msra.mxu0 %v2801_v13  ;;  %v1146_v13 = vld [vmem:[#allocation8 + $0x2c8] sm:$0xff] }
  0xc6   : > { %2806 = vmatprep.subr.bf16.mxu0 %v2805_v19 }
 0x17b   : > { %v2291_v25 = vpop.f32.mrb[0].mxu0 }
 0x17c   : > { %v390_v26 = vadd.f32 %v2291_v25, %v1981_v24  ;;  %v384_v27 = vpop.f32.mrb[1].mxu0  ;;  %v477_v25 = vld [vmem:[#allocation8 + $0x268] sm:$0xff] }
 0x17d   : > { %v385_v28 = vadd.f32 %v1981_v24, %v384_v27  ;;  %v1149_v27 = vld [vmem:[#allocation8 + $0x2e0] sm:$0xff] }
 0x17e   : > { %v3775_v29 = vmax.f32 %v390_v26, 0.0  ;;  %v2953_v26 = vpack.c.bf16 %v1148_v21, %v1147_v20  ;;  %v1284_v20 = vld [vmem:[#allocation8 + $0x340] sm:$0xff]  ;;  %v1285_v21 = vld [vmem:[#allocation8 + $0x348] sm:$0xff] }
 0x17f   : > { %v3777_v30 = vmax.f32 %v385_v28, 0.0  ;;  %v2294_v31 = vpop.f32.mrb[2].mxu0  ;;  %v1150_v28 = vld [vmem:[#allocation8 + $0x2e8] sm:$0xff] }
 0x180   : > { %456 = vst [vmem:[#allocation2 + $0x38] sm:$0xff] %v3775_v29  ;;  %v400_v32 = vadd.f32 %v2294_v31, %v1981_v24  ;;  %v394_v33 = vpop.f32.mrb[3].mxu0 }
 0x181   : > { %455 = vst [vmem:[#allocation2 + $0x20] sm:$0xff] %v3777_v30  ;;  %v395_v34 = vadd.f32 %v1981_v24, %v394_v33  ;;  %v479_v33 = vld [vmem:[#allocation8 + $0x278] sm:$0xff] }
 0x182   : > { %v3781_v35 = vmax.f32 %v400_v32, 0.0  ;;  %v478_v32 = vld [vmem:[#allocation8 + $0x270] sm:$0xff] }
 0x183   : > { %v3783_v36 = vmax.f32 %v395_v34, 0.0  ;;  %v2297_v37 = vpop.f32.mrb[4].mxu0  ;;  %v2957_v34 = vpack.c.bf16 %v1150_v28, %v1149_v27  ;;  %v2981_v27 = vpack.c.bf16 %v1285_v21, %v1284_v20  ;;  %v1420_v20 = vld [vmem:[#allocation8 + $0x3b0] sm:$0xff]  ;;  %v1421_v21 = vld [vmem:[#allocation8 + $0x3b8] sm:$0xff] }
 0x184   : > { %458 = vst [vmem:[#allocation2 + $0x68] sm:$0xff] %v3781_v35  ;;  %v410_v38 = vadd.f32 %v2297_v37, %v1981_v24  ;;  %v404_v39 = vpop.f32.mrb[5].mxu0  ;;  %v1151_v37 = vld [vmem:[#allocation8 + $0x2f0] sm:$0xff] }
 0x185   : > { %457 = vst [vmem:[#allocation2 + $0x50] sm:$0xff] %v3783_v36  ;;  %v405_v42 = vadd.f32 %v1981_v24, %v404_v39  ;;  %v2833_v39 = vpack.c.bf16 %v479_v33, %v478_v32  ;;  %v1287_v32 = vld [vmem:[#allocation8 + $0x358] sm:$0xff] }
 0x186   : > { %v3787_v43 = vmax.f32 %v410_v38, 0.0  ;;  %v1152_v38 = vld [vmem:[#allocation8 + $0x2f8] sm:$0xff] }
 0x187   : > { %v3789_v44 = vmax.f32 %v405_v42, 0.0  ;;  %v2300_v45 = vpop.f32.mrb[6].mxu0  ;;  %v3793_v53 = vld [vmem:[#allocation2 + $0x37] sm:$0xff]  ;;  %v2961_v42 = vpack.c.bf16 %v1152_v38, %v1151_v37 }
 0x188   : > { %460 = vst [vmem:[#allocation2 + $0x98] sm:$0xff] %v3787_v43  ;;  %v420_v49 = vadd.f32 %v2300_v45, %v1981_v24  ;;  %v414_v50 = vpop.f32.mrb[7].mxu0  ;;  %v481_v51 = vld [vmem:[#allocation2 + $0x1f] sm:$0xff]  ;;  %v1276_v45 = vld [vmem:[#allocation8 + $0x300] sm:$0xff] }
 0x189   : > { %459 = vst [vmem:[#allocation2 + $0x80] sm:$0xff] %v3789_v44  ;;  %v415_v52 = vadd.f32 %v1981_v24, %v414_v50  ;;  %2334 = vmatmul.mubr.f32.vlgmr.msra.gmra.mrb[8].mxu0 %v481_v51  ;;  %2509 = vmatprep.mubr.f32.mxu1 %v481_v51  ;;  %v3827_v22 = vld [vmem:[#allocation2 + $0x21] sm:$0xff]  ;;  %v476_v24 = vld [vmem:[#allocation8 + $0x260] sm:$0xff]  ;;  %v3832_v60 = vld [vmem:[#allocation2 + $0x39] sm:$0xff] }
 0x18a   : > { %v3795_v56 = vmax.f32 %v420_v49, 0.0  ;;  %2808 = vmatpush3.bf16.msra.mxu0 %v2805_v19  ;;  %2336 = vmatprep.mubr.f32.mxu0 %v3793_v53  ;;  %v2949_v19 = vpack.c.bf16 %v1146_v13, %v1145_v12  ;;  %v2829_v31 = vpack.c.bf16 %v477_v25, %v476_v24  ;;  %v726_v49 = vld [vmem:[#allocation8 + $0x98] sm:$0xff]  ;;  %v1278_v51 = vld [vmem:[#allocation8 + $0x310] sm:$0xff]  ;;  %v2849_v13 = vpack.c.bf16 %v730_v4, %v729_v3  ;;  %v736_v37 = vld [vmem:[#allocation8 + $0xe8] sm:$0xff] }
 0x18b   : > { %v3798_v58 = vmax.f32 %v415_v52, 0.0  ;;  %2510 = vmatmul.mubr.f32.vlgmr.msra.gmra.mrb[0].mxu1 %v3793_v53  ;;  %2810 = vmatprep.subr.bf16.mxu0 %v2809_v46  ;;  %v3804_v62 = vld [vmem:[#allocation2 + $0x67] sm:$0xff]  ;;  %v2841_v54 = vpack.c.bf16 %v726_v49, %v725_v48  ;;  %v865_v4 = vld [vmem:[#allocation8 + $0x120] sm:$0xff] }
 0x18c   : > { %462 = vst [vmem:[#allocation2 + $0xc8] sm:$0xff] %v3795_v56  ;;  %2936 = vmatpush3.bf16.msra.mxu1 %v2933_v23  ;;  %v3802_v61 = vld [vmem:[#allocation2 + $0x4f] sm:$0xff]  ;;  %v2825_v23 = vpack.c.bf16 %v475_v17, %v474_v14  ;;  %v732_v17 = vld [vmem:[#allocation8 + $0xc8] sm:$0xff]  ;;  %v733_v25 = vld [vmem:[#allocation8 + $0xd0] sm:$0xff] }
 0x18d   : > { %461 = vst [vmem:[#allocation2 + $0xb0] sm:$0xff] %v3798_v58  ;;  %2337 = vmatmul.mubr.f32.gmra.mrb[10].mxu0 %v3802_v61  ;;  %2512 = vmatprep.mubr.f32.mxu1 %v3802_v61  ;;  %v1279_v52 = vld [vmem:[#allocation8 + $0x318] sm:$0xff]  ;;  %v3835_v1 = vld [vmem:[#allocation2 + $0x51] sm:$0xff] }
 0x18e   : > { %2812 = vmatpush3.bf16.msra.mxu0 %v2809_v46  ;;  %2938 = vmatprep.subr.bf16.mxu1 %v2937_v57  ;;  %v1277_v46 = vld [vmem:[#allocation8 + $0x308] sm:$0xff]  ;;  %v2969_v59 = vpack.c.bf16 %v1279_v52, %v1278_v51  ;;  %v3840_v8 = vld [vmem:[#allocation2 + $0x69] sm:$0xff] }
 0x18f   : > { %2513 = vmatmul.mubr.f32.gmra.mrb[2].mxu1 %v3804_v62  ;;  %2339 = vmatprep.mubr.f32.mxu0 %v3804_v62  ;;  %v3813_v6 = vld [vmem:[#allocation2 + $0x97] sm:$0xff]  ;;  %v2965_v50 = vpack.c.bf16 %v1277_v46, %v1276_v45  ;;  %v738_v45 = vld [vmem:[#allocation8 + $0xf8] sm:$0xff] }
 0x190   : > { %2940 = vmatpush3.bf16.msra.mxu1 %v2937_v57  ;;  %2814 = vmatprep.subr.bf16.mxu0 %v2813_v63  ;;  %v3811_v5 = vld [vmem:[#allocation2 + $0x7f] sm:$0xff]  ;;  %v731_v14 = vld [vmem:[#allocation8 + $0xc0] sm:$0xff]  ;;  %v1291_v48 = vld [vmem:[#allocation8 + $0x378] sm:$0xff] }
 0x191   : > { %2340 = vmatmul.mubr.f32.gmra.mrb[12].mxu0 %v3811_v5  ;;  %2515 = vmatprep.mubr.f32.mxu1 %v3811_v5  ;;  %v728_v57 = vld [vmem:[#allocation8 + $0xa8] sm:$0xff]  ;;  %v3843_v12 = vld [vmem:[#allocation2 + $0x81] sm:$0xff]  ;;  %v2853_v24 = vpack.c.bf16 %v732_v17, %v731_v14  ;;  %v1414_v52 = vld [vmem:[#allocation8 + $0x380] sm:$0xff] }
 0x192   : > { %2816 = vmatpush3.bf16.msra.mxu0 %v2813_v63  ;;  %2942 = vmatprep.subr.bf16.mxu1 %v2941_v2  ;;  %v1280_v63 = vld [vmem:[#allocation8 + $0x320] sm:$0xff]  ;;  %v867_v17 = vld [vmem:[#allocation8 + $0x130] sm:$0xff] }
 0x193   : > { %2516 = vmatmul.mubr.f32.gmra.mrb[4].mxu1 %v3813_v6  ;;  %2342 = vmatprep.mubr.f32.mxu0 %v3813_v6  ;;  %v3821_v16 = vld [vmem:[#allocation2 + $0xc7] sm:$0xff] }
 0x194   : > { %2944 = vmatpush3.bf16.msra.mxu1 %v2941_v2  ;;  %2818 = vmatprep.subr.bf16.mxu0 %v2817_v7  ;;  %v3819_v15 = vld [vmem:[#allocation2 + $0xaf] sm:$0xff]  ;;  %v2845_v2 = vpack.c.bf16 %v728_v57, %v727_v55  ;;  %v863_v57 = vld [vmem:[#allocation8 + $0x110] sm:$0xff] }
 0x195   : > { %2343 = vmatmul.mubr.f32.gmra.mrb[14].mxu0 %v3819_v15  ;;  %2518 = vmatprep.mubr.f32.mxu1 %v3819_v15  ;;  %v3855_v28 = vld [vmem:[#allocation2 + $0xc9] sm:$0xff] }
 0x196   : > { %2820 = vmatpush3.bf16.msra.mxu0 %v2817_v7  ;;  %2946 = vmatprep.subr.bf16.mxu1 %v2945_v9  ;;  %v2973_v7 = vpack.c.bf16 %v1281_v0, %v1280_v63  ;;  %v1416_v0 = vld [vmem:[#allocation8 + $0x390] sm:$0xff] }
 0x197   : > { %2377 = vmatprep.mubr.f32.mxu0 %v3777_v30  ;;  %2519 = vmatmul.mubr.f32.gmra.mrb[6].mxu1 %v3821_v16 }
 0x198   : > { %2948 = vmatpush3.bf16.msra.mxu1 %v2945_v9  ;;  %2553 = vmatprep.mubr.f32.mxu1 %v3827_v22  ;;  %v1282_v9 = vld [vmem:[#allocation8 + $0x330] sm:$0xff] }
 0x199   : > { %2822 = vmatprep.subr.bf16.mxu0 %v2821_v18  ;;  %2950 = vmatprep.subr.bf16.mxu1 %v2949_v19 }
 0x19a   : > { %2824 = vmatpush3.bf16.msra.mxu0 %v2821_v18  ;;  %v2977_v18 = vpack.c.bf16 %v1283_v11, %v1282_v9  ;;  %v1418_v11 = vld [vmem:[#allocation8 + $0x3a0] sm:$0xff] }
 0x19b   : > { %2826 = vmatprep.subr.bf16.mxu0 %v2825_v23 }
 0x19c   : > { %2952 = vmatpush3.bf16.msra.mxu1 %v2949_v19  ;;  %v3848_v19 = vld [vmem:[#allocation2 + $0x99] sm:$0xff] }
 0x19d   : > { %2954 = vmatprep.subr.bf16.mxu1 %v2953_v26 }
 0x19e   : > { %2828 = vmatpush3.bf16.msra.mxu0 %v2825_v23  ;;  %v3851_v23 = vld [vmem:[#allocation2 + $0xb1] sm:$0xff] }
 0x19f   : > { %2830 = vmatprep.subr.bf16.mxu0 %v2829_v31 }
 0x1a0   : > { %2956 = vmatpush3.bf16.msra.mxu1 %v2953_v26  ;;  %v734_v26 = vld [vmem:[#allocation8 + $0xd8] sm:$0xff] }
 0x1a1   : > { %2958 = vmatprep.subr.bf16.mxu1 %v2957_v34  ;;  %v2857_v33 = vpack.c.bf16 %v734_v26, %v733_v25  ;;  %v3009_v25 = vpack.c.bf16 %v1421_v21, %v1420_v20  ;;  %v1422_v26 = vld [vmem:[#allocation8 + $0x3c0] sm:$0xff]  ;;  %v1558_v20 = vld [vmem:[#allocation8 + $0x430] sm:$0xff]  ;;  %v1559_v21 = vld [vmem:[#allocation8 + $0x438] sm:$0xff] }
 0x1a2   : > { %2832 = vmatpush3.bf16.msra.mxu0 %v2829_v31  ;;  %v1286_v31 = vld [vmem:[#allocation8 + $0x350] sm:$0xff] }
 0x1a3   : > { %2834 = vmatprep.subr.bf16.mxu0 %v2833_v39  ;;  %v2985_v38 = vpack.c.bf16 %v1287_v32, %v1286_v31  ;;  %v852_v31 = vld [vmem:[#allocation2 + $0x9] sm:$0xff]  ;;  %v871_v32 = vld [vmem:[#allocation8 + $0x150] sm:$0xff] }
 0x1a4   : > { %2960 = vmatpush3.bf16.msra.mxu1 %v2957_v34  ;;  %v735_v34 = vld [vmem:[#allocation8 + $0xe0] sm:$0xff] }
 0x1a5   : > { %2962 = vmatprep.subr.bf16.mxu1 %v2961_v42  ;;  %v2861_v41 = vpack.c.bf16 %v736_v37, %v735_v34  ;;  %v1424_v37 = vld [vmem:[#allocation8 + $0x3d0] sm:$0xff] }
 0x1a6   : > { %2836 = vmatpush3.bf16.msra.mxu0 %v2833_v39  ;;  %v1288_v39 = vld [vmem:[#allocation8 + $0x360] sm:$0xff] }
 0x1a7   : > { %2838 = vmatprep.subr.bf16.mxu0 %v2837_v47  ;;  %v2989_v46 = vpack.c.bf16 %v1289_v40, %v1288_v39  ;;  %v873_v39 = vld [vmem:[#allocation8 + $0x160] sm:$0xff] }
 0x1a8   : > { %2964 = vmatpush3.bf16.msra.mxu1 %v2961_v42  ;;  %v737_v42 = vld [vmem:[#allocation8 + $0xf0] sm:$0xff] }
 0x1a9   : > { %2378 = vmatmul.mubr.f32.vlgmr.msra.gmra.mrb[8].mxu0 %v3775_v29  ;;  %2966 = vmatprep.subr.bf16.mxu1 %v2965_v50  ;;  %v2865_v49 = vpack.c.bf16 %v738_v45, %v737_v42  ;;  %v1427_v42 = vld [vmem:[#allocation8 + $0x3e8] sm:$0xff] }
 0x1aa   : > { %2380 = vmatprep.mubr.f32.mxu0 %v3783_v36  ;;  %2840 = vmatpush3.bf16.msra.mxu0 %v2837_v47  ;;  %v1290_v47 = vld [vmem:[#allocation8 + $0x370] sm:$0xff] }
 0x1ab   : > { %2554 = vmatmul.mubr.f32.vlgmr.msra.gmra.mrb[0].mxu1 %v3832_v60  ;;  %2842 = vmatprep.subr.bf16.mxu0 %v2841_v54  ;;  %v2993_v51 = vpack.c.bf16 %v1291_v48, %v1290_v47  ;;  %v876_v47 = vld [vmem:[#allocation8 + $0x178] sm:$0xff] }
 0x1ac   : > { %2556 = vmatprep.mubr.f32.mxu1 %v3835_v1  ;;  %2968 = vmatpush3.bf16.msra.mxu1 %v2965_v50  ;;  %v862_v50 = vld [vmem:[#allocation8 + $0x108] sm:$0xff] }
 0x1ad   : > { %2381 = vmatmul.mubr.f32.gmra.mrb[10].mxu0 %v3781_v35  ;;  %2970 = vmatprep.subr.bf16.mxu1 %v2969_v59 }
 0x1ae   : > { %2383 = vmatprep.mubr.f32.mxu0 %v3789_v44  ;;  %2844 = vmatpush3.bf16.msra.mxu0 %v2841_v54  ;;  %v1415_v54 = vld [vmem:[#allocation8 + $0x388] sm:$0xff] }
 0x1af   : > { %2557 = vmatmul.mubr.f32.gmra.mrb[2].mxu1 %v3840_v8  ;;  %2846 = vmatprep.subr.bf16.mxu0 %v2845_v2  ;;  %v2997_v63 = vpack.c.bf16 %v1415_v54, %v1414_v52  ;;  %v1552_v54 = vld [vmem:[#allocation8 + $0x400] sm:$0xff] }
 0x1b0   : > { %2559 = vmatprep.mubr.f32.mxu1 %v3843_v12  ;;  %2972 = vmatpush3.bf16.msra.mxu1 %v2969_v59  ;;  %v864_v59 = vld [vmem:[#allocation8 + $0x118] sm:$0xff] }
 0x1b1   : > { %2384 = vmatmul.mubr.f32.gmra.mrb[12].mxu0 %v3787_v43  ;;  %2974 = vmatprep.subr.bf16.mxu1 %v2973_v7  ;;  %v2873_v3 = vpack.c.bf16 %v864_v59, %v863_v57  ;;  %v1699_v59 = vld [vmem:[#allocation9 + $0x10] sm:$0xff] }
 0x1b2   : > { %2386 = vmatprep.mubr.f32.mxu0 %v3798_v58  ;;  %2848 = vmatpush3.bf16.msra.mxu0 %v2845_v2  ;;  %v1417_v2 = vld [vmem:[#allocation8 + $0x398] sm:$0xff] }
 0x1b3   : > { %2560 = vmatmul.mubr.f32.gmra.mrb[4].mxu1 %v3848_v19  ;;  %2850 = vmatprep.subr.bf16.mxu0 %v2849_v13  ;;  %v3001_v9 = vpack.c.bf16 %v1417_v2, %v1416_v0  ;;  %v1554_v2 = vld [vmem:[#allocation8 + $0x410] sm:$0xff] }
 0x1b4   : > { %2562 = vmatprep.mubr.f32.mxu1 %v3851_v23  ;;  %2976 = vmatpush3.bf16.msra.mxu1 %v2973_v7  ;;  %v866_v7 = vld [vmem:[#allocation8 + $0x128] sm:$0xff] }
 0x1b5   : > { %2387 = vmatmul.mubr.f32.gmra.mrb[14].mxu0 %v3795_v56  ;;  %2978 = vmatprep.subr.bf16.mxu1 %v2977_v18  ;;  %v2877_v14 = vpack.c.bf16 %v866_v7, %v865_v4  ;;  %v1701_v7 = vld [vmem:[#allocation9 + $0x20] sm:$0xff] }
 0x1b6   : > { %2852 = vmatpush3.bf16.msra.mxu0 %v2849_v13  ;;  %2421 = vmatprep.mubr.f32.mxu0 %v3483_v10  ;;  %v1419_v13 = vld [vmem:[#allocation8 + $0x3a8] sm:$0xff] }
 0x1b7   : > { %2563 = vmatmul.mubr.f32.gmra.mrb[6].mxu1 %v3855_v28  ;;  %2854 = vmatprep.subr.bf16.mxu0 %v2853_v24 }
 0x1b8   : > { %2980 = vmatpush3.bf16.msra.mxu1 %v2977_v18  ;;  %2597 = vmatprep.mubr.f32.mxu1 %v3793_v53  ;;  %v861_v53 = vld [vmem:[#allocation8 + $0x100] sm:$0xff]  ;;  %v868_v18 = vld [vmem:[#allocation8 + $0x138] sm:$0xff] }
 0x1b9   : > { %2982 = vmatprep.subr.bf16.mxu1 %v2981_v27  ;;  %v2869_v55 = vpack.c.bf16 %v862_v50, %v861_v53  ;;  %v1429_v53 = vld [vmem:[#allocation8 + $0x3f8] sm:$0xff] }
 0x1ba   : > { %2856 = vmatpush3.bf16.msra.mxu0 %v2853_v24  ;;  %v870_v24 = vld [vmem:[#allocation8 + $0x148] sm:$0xff] }
 0x1bb   : > { %2858 = vmatprep.subr.bf16.mxu0 %v2857_v33 }
 0x1bc   : > { %2984 = vmatpush3.bf16.msra.mxu1 %v2981_v27  ;;  %v1423_v27 = vld [vmem:[#allocation8 + $0x3c8] sm:$0xff] }
 0x1bd   : > { %2986 = vmatprep.subr.bf16.mxu1 %v2985_v38  ;;  %v3013_v34 = vpack.c.bf16 %v1423_v27, %v1422_v26  ;;  %v1708_v26 = vld [vmem:[#allocation9 + $0x58] sm:$0xff] }
 0x1be   : > { %2860 = vmatpush3.bf16.msra.mxu0 %v2857_v33  ;;  %v872_v33 = vld [vmem:[#allocation8 + $0x158] sm:$0xff] }
 0x1bf   : > { %2862 = vmatprep.subr.bf16.mxu0 %v2861_v41 }
 0x1c0   : > { %2988 = vmatpush3.bf16.msra.mxu1 %v2985_v38  ;;  %v1425_v38 = vld [vmem:[#allocation8 + $0x3d8] sm:$0xff] }
 0x1c1   : > { %2990 = vmatprep.subr.bf16.mxu1 %v2989_v46  ;;  %v3017_v40 = vpack.c.bf16 %v1425_v38, %v1424_v37  ;;  %v1565_v37 = vld [vmem:[#allocation8 + $0x468] sm:$0xff] }
 0x1c2   : > { %2864 = vmatpush3.bf16.msra.mxu0 %v2861_v41  ;;  %v1426_v41 = vld [vmem:[#allocation8 + $0x3e0] sm:$0xff] }
 0x1c3   : > { %2866 = vmatprep.subr.bf16.mxu0 %v2865_v49  ;;  %v3021_v48 = vpack.c.bf16 %v1427_v42, %v1426_v41  ;;  %v3280_v42 = vld [vmem:[%s3728_s6 + $0x8] sm:$0xff] }
 0x1c4   : > { %2992 = vmatpush3.bf16.msra.mxu1 %v2989_v46  ;;  %v875_v46 = vld [vmem:[#allocation8 + $0x170] sm:$0xff] }
 0x1c5   : > { %2994 = vmatprep.subr.bf16.mxu1 %v2993_v51  ;;  %v2897_v50 = vpack.c.bf16 %v876_v47, %v875_v46  ;;  %v3282_v46 = vld [vmem:[%s3728_s6 + $0x18] sm:$0xff] }
 0x1c6   : > { %2868 = vmatpush3.bf16.msra.mxu0 %v2865_v49  ;;  %v1428_v49 = vld [vmem:[#allocation8 + $0x3f0] sm:$0xff] }
 0x1c7   : > { %2870 = vmatprep.subr.bf16.mxu0 %v2869_v55  ;;  %v3025_v52 = vpack.c.bf16 %v1429_v53, %v1428_v49 }
 0x1c8   : > { %2996 = vmatpush3.bf16.msra.mxu1 %v2993_v51  ;;  %v1698_v51 = vld [vmem:[#allocation9 + $0x8] sm:$0xff] }
 0x1c9   : > { %2422 = vmatmul.mubr.f32.vlgmr.msra.gmra.mrb[8].mxu0 %v3777_v30  ;;  %2998 = vmatprep.subr.bf16.mxu1 %v2997_v63  ;;  %v3005_v30 = vpack.c.bf16 %v1419_v13, %v1418_v11  ;;  %v1556_v13 = vld [vmem:[#allocation8 + $0x420] sm:$0xff] }
 0x1ca   : > { %2424 = vmatprep.mubr.f32.mxu0 %v3775_v29  ;;  %2872 = vmatpush3.bf16.msra.mxu0 %v2869_v55  ;;  %v1553_v55 = vld [vmem:[#allocation8 + $0x408] sm:$0xff] }
 0x1cb   : > { %2598 = vmatmul.mubr.f32.vlgmr.msra.gmra.mrb[0].mxu1 %v3802_v61  ;;  %2874 = vmatprep.subr.bf16.mxu0 %v2873_v3  ;;  %v2881_v61 = vpack.c.bf16 %v868_v18, %v867_v17  ;;  %v3029_v0 = vpack.c.bf16 %v1553_v55, %v1552_v54  ;;  %v1703_v18 = vld [vmem:[#allocation9 + $0x30] sm:$0xff] }
 0x1cc   : > { %2600 = vmatprep.mubr.f32.mxu1 %v3804_v62  ;;  %3000 = vmatpush3.bf16.msra.mxu1 %v2997_v63  ;;  %v869_v62 = vld [vmem:[#allocation8 + $0x140] sm:$0xff]  ;;  %v1700_v63 = vld [vmem:[#allocation9 + $0x18] sm:$0xff] }
 0x1cd   : > { %2425 = vmatmul.mubr.f32.gmra.mrb[10].mxu0 %v3783_v36  ;;  %3002 = vmatprep.subr.bf16.mxu1 %v3001_v9  ;;  %v3877_v4 = vpack.c.bf16 %v1700_v63, %v1699_v59  ;;  %v1983_v63 = vld [vmem:[%s4006_s4 + $0x1] ss:$0 sm:$0xff] }
 0x1ce   : > { %2427 = vmatprep.mubr.f32.mxu0 %v3781_v35  ;;  %2876 = vmatpush3.bf16.msra.mxu0 %v2873_v3  ;;  %v1555_v3 = vld [vmem:[#allocation8 + $0x418] sm:$0xff] }
 0x1cf   : > { %2601 = vmatmul.mubr.f32.gmra.mrb[2].mxu1 %v3811_v5  ;;  %2878 = vmatprep.subr.bf16.mxu0 %v2877_v14  ;;  %v2885_v5 = vpack.c.bf16 %v870_v24, %v869_v62  ;;  %v3033_v11 = vpack.c.bf16 %v1555_v3, %v1554_v2  ;;  %v3041_v62 = vpack.c.bf16 %v1559_v21, %v1558_v20  ;;  %v1560_v24 = vld [vmem:[#allocation8 + $0x440] sm:$0xff] }
 0x1d0   : > { %2603 = vmatprep.mubr.f32.mxu1 %v3813_v6  ;;  %3004 = vmatpush3.bf16.msra.mxu1 %v3001_v9  ;;  %v1274_v6 = vld [vmem:[#allocation2 + $0xdf] sm:$0xff] }
 0x1d1   : > { %2428 = vmatmul.mubr.f32.gmra.mrb[12].mxu0 %v3789_v44  ;;  %3006 = vmatprep.subr.bf16.mxu1 %v3005_v30  ;;  %v1702_v9 = vld [vmem:[#allocation9 + $0x28] sm:$0xff] }
 0x1d2   : > { %2430 = vmatprep.mubr.f32.mxu0 %v3787_v43  ;;  %2880 = vmatpush3.bf16.msra.mxu0 %v2877_v14  ;;  %v1557_v14 = vld [vmem:[#allocation8 + $0x428] sm:$0xff]  ;;  %v3884_v17 = vpack.c.bf16 %v1702_v9, %v1701_v7 }
 0x1d3   : > { %2604 = vmatmul.mubr.f32.gmra.mrb[4].mxu1 %v3819_v15  ;;  %2882 = vmatprep.subr.bf16.mxu0 %v2881_v61  ;;  %v2889_v15 = vpack.c.bf16 %v872_v33, %v871_v32  ;;  %v1710_v32 = vld [vmem:[#allocation9 + $0x68] sm:$0xff] }
 0x1d4   : > { %2606 = vmatprep.mubr.f32.mxu1 %v3821_v16  ;;  %3008 = vmatpush3.bf16.msra.mxu1 %v3005_v30  ;;  %v874_v16 = vld [vmem:[#allocation8 + $0x168] sm:$0xff]  ;;  %v1704_v30 = vld [vmem:[#allocation9 + $0x38] sm:$0xff] }
 0x1d5   : > { %2431 = vmatmul.mubr.f32.gmra.mrb[14].mxu0 %v3798_v58  ;;  %3010 = vmatprep.subr.bf16.mxu1 %v3009_v25  ;;  %v2893_v45 = vpack.c.bf16 %v874_v16, %v873_v39  ;;  %v1712_v39 = vld [vmem:[#allocation9 + $0x78] sm:$0xff]  ;;  %v1566_v16 = vld [vmem:[#allocation8 + $0x470] sm:$0xff] }
 0x1d6   : > { %2884 = vmatpush3.bf16.msra.mxu0 %v2881_v61  ;;  %2465 = vmatprep.mubr.f32.mxu0 %v852_v31  ;;  %v1706_v61 = vld [vmem:[#allocation9 + $0x48] sm:$0xff]  ;;  %v1563_v31 = vld [vmem:[#allocation8 + $0x458] sm:$0xff] }
 0x1d7   : > { %2607 = vmatmul.mubr.f32.gmra.mrb[6].mxu1 %v1274_v6  ;;  %2886 = vmatprep.subr.bf16.mxu0 %v2885_v5  ;;  %v3279_v6 = vld [vmem:[%s3728_s6] sm:$0xff] }
 0x1d8   : > { %3012 = vmatpush3.bf16.msra.mxu1 %v3009_v25  ;;  %2641 = vmatprep.mubr.f32.mxu1 %v3775_v29  ;;  %v1697_v29 = vld [vmem:[#allocation9] sm:$0xff] }
 0x1d9   : > { %3014 = vmatprep.subr.bf16.mxu1 %v3013_v34  ;;  %v3874_v57 = vpack.c.bf16 %v1698_v51, %v1697_v29 }
 0x1da   : > { %2888 = vmatpush3.bf16.msra.mxu0 %v2885_v5  ;;  %v1562_v5 = vld [vmem:[#allocation8 + $0x450] sm:$0xff] }
 0x1db   : > { %2890 = vmatprep.subr.bf16.mxu0 %v2889_v15  ;;  %v3049_v33 = vpack.c.bf16 %v1563_v31, %v1562_v5 }
 0x1dc   : > { %3016 = vmatpush3.bf16.msra.mxu1 %v3013_v34  ;;  %v1564_v34 = vld [vmem:[#allocation8 + $0x460] sm:$0xff] }
 0x1dd   : > { %3018 = vmatprep.subr.bf16.mxu1 %v3017_v40 }
 0x1de   : > { %2892 = vmatpush3.bf16.msra.mxu0 %v2889_v15  ;;  %v1711_v15 = vld [vmem:[#allocation9 + $0x70] sm:$0xff] }
 0x1df   : > { %2894 = vmatprep.subr.bf16.mxu0 %v2893_v45 }
 0x1e0   : > { %3020 = vmatpush3.bf16.msra.mxu1 %v3017_v40  ;;  %v3089_v40 = vpack.c.bf16 %v1712_v39, %v1711_v15 }
 0x1e1   : > { %3022 = vmatprep.subr.bf16.mxu1 %v3021_v48 }
 0x1e2   : > { %2896 = vmatpush3.bf16.msra.mxu0 %v2893_v45  ;;  %v3281_v45 = vld [vmem:[%s3728_s6 + $0x10] sm:$0xff] }
 0x1e3   : > { %2898 = vmatprep.subr.bf16.mxu0 %v2897_v50 }
 0x1e4   : > { %3024 = vmatpush3.bf16.msra.mxu1 %v3021_v48 }
 0x1e5   : > { %3026 = vmatprep.subr.bf16.mxu1 %v3025_v52 }
 0x1e6   : > { %2900 = vmatpush3.bf16.msra.mxu0 %v2897_v50 }
 0x1e7   : > { %3062 = vmatprep.subr.bf16.mxu0 %v3874_v57 }
 0x1e8   : > { %3028 = vmatpush3.bf16.msra.mxu1 %v3025_v52 }
 0x1e9   : > { %2466 = vmatmul.mubr.f32.vlgmr.msra.gmra.mrb[8].mxu0 %v3827_v22  ;;  %3030 = vmatprep.subr.bf16.mxu1 %v3029_v0  ;;  %v3037_v22 = vpack.c.bf16 %v1557_v14, %v1556_v13 }
 0x1ea   : > { %2468 = vmatprep.mubr.f32.mxu0 %v3832_v60  ;;  %3064 = vmatpush3.bf16.msra.mxu0 %v3874_v57 }
 0x1eb   : > { %2642 = vmatmul.mubr.f32.vlgmr.msra.gmra.mrb[0].mxu1 %v3783_v36  ;;  %3066 = vmatprep.subr.bf16.mxu0 %v3877_v4  ;;  %v3892_v36 = vpack.c.bf16 %v1704_v30, %v1703_v18 }
 0x1ec   : > { %2644 = vmatprep.mubr.f32.mxu1 %v3781_v35  ;;  %3032 = vmatpush3.bf16.msra.mxu1 %v3029_v0  ;;  %v1705_v35 = vld [vmem:[#allocation9 + $0x40] sm:$0xff] }
 0x1ed   : > { %2469 = vmatmul.mubr.f32.gmra.mrb[10].mxu0 %v3835_v1  ;;  %3034 = vmatprep.subr.bf16.mxu1 %v3033_v11  ;;  %v3900_v25 = vpack.c.bf16 %v1706_v61, %v1705_v35 }
 0x1ee   : > { %2471 = vmatprep.mubr.f32.mxu0 %v3840_v8  ;;  %3068 = vmatpush3.bf16.msra.mxu0 %v3877_v4 }
 0x1ef   : > { %2645 = vmatmul.mubr.f32.gmra.mrb[2].mxu1 %v3789_v44  ;;  %3070 = vmatprep.subr.bf16.mxu0 %v3884_v17  ;;  %v1561_v44 = vld [vmem:[#allocation8 + $0x448] sm:$0xff] }
 0x1f0   : > { %2647 = vmatprep.mubr.f32.mxu1 %v3787_v43  ;;  %3036 = vmatpush3.bf16.msra.mxu1 %v3033_v11  ;;  %v1707_v43 = vld [vmem:[#allocation9 + $0x50] sm:$0xff]  ;;  %v3045_v27 = vpack.c.bf16 %v1561_v44, %v1560_v24 }
 0x1f1   : > { %2472 = vmatmul.mubr.f32.gmra.mrb[12].mxu0 %v3843_v12  ;;  %3038 = vmatprep.subr.bf16.mxu1 %v3037_v22 }
 0x1f2   : > { %2474 = vmatprep.mubr.f32.mxu0 %v3848_v19  ;;  %3072 = vmatpush3.bf16.msra.mxu0 %v3884_v17 }
 0x1f3   : > { %2648 = vmatmul.mubr.f32.gmra.mrb[4].mxu1 %v3798_v58  ;;  %3074 = vmatprep.subr.bf16.mxu0 %v3892_v36  ;;  %v3081_v58 = vpack.c.bf16 %v1708_v26, %v1707_v43 }
 0x1f4   : > { %2650 = vmatprep.mubr.f32.mxu1 %v3795_v56  ;;  %3040 = vmatpush3.bf16.msra.mxu1 %v3037_v22  ;;  %v1709_v56 = vld [vmem:[#allocation9 + $0x60] sm:$0xff] }
 0x1f5   : > { %2475 = vmatmul.mubr.f32.gmra.mrb[14].mxu0 %v3851_v23  ;;  %3042 = vmatprep.subr.bf16.mxu1 %v3041_v62  ;;  %v3085_v38 = vpack.c.bf16 %v1710_v32, %v1709_v56 }
 0x1f6   : > { %3076 = vmatpush3.bf16.msra.mxu0 %v3892_v36  ;;  %2729 = vmatprep.mubr.f32.mxu0 %v3279_v6 }
 0x1f7   : > { %2651 = vmatmul.mubr.f32.gmra.mrb[6].mxu1 %v3483_v10  ;;  %3078 = vmatprep.subr.bf16.mxu0 %v3900_v25  ;;  %v3053_v10 = vpack.c.bf16 %v1565_v37, %v1564_v34 }
 0x1f8   : > { %3044 = vmatpush3.bf16.msra.mxu1 %v3041_v62  ;;  %2685 = vmatprep.mubr.f32.mxu1 %v3832_v60  ;;  %v1567_v60 = vld [vmem:[#allocation8 + $0x478] sm:$0xff] }
 0x1f9   : > { %3046 = vmatprep.subr.bf16.mxu1 %v3045_v27  ;;  %v3057_v41 = vpack.c.bf16 %v1567_v60, %v1566_v16 }
 0x1fa   : > { %3080 = vmatpush3.bf16.msra.mxu0 %v3900_v25 }
 0x1fb   : > { %3082 = vmatprep.subr.bf16.mxu0 %v3081_v58 }
 0x1fc   : > { %3048 = vmatpush3.bf16.msra.mxu1 %v3045_v27 }
 0x1fd   : > { %3050 = vmatprep.subr.bf16.mxu1 %v3049_v33 }
 0x1fe   : > { %3084 = vmatpush3.bf16.msra.mxu0 %v3081_v58 }
 0x1ff   : > { %3086 = vmatprep.subr.bf16.mxu0 %v3085_v38 }
 0x200   : > { %3052 = vmatpush3.bf16.msra.mxu1 %v3049_v33 }
 0x201   : > { %3054 = vmatprep.subr.bf16.mxu1 %v3053_v10 }
 0x202   : > { %3088 = vmatpush3.bf16.msra.mxu0 %v3085_v38 }
 0x203   : > { %3090 = vmatprep.subr.bf16.mxu0 %v3089_v40 }
 0x204   : > { %3056 = vmatpush3.bf16.msra.mxu1 %v3053_v10 }
 0x205   : > { %3058 = vmatprep.subr.bf16.mxu1 %v3057_v41 }
 0x206   : > { %3092 = vmatpush3.bf16.msra.mxu0 %v3089_v40 }
 0x208   : > { %3060 = vmatpush3.bf16.msra.mxu1 %v3057_v41 }
 0x209   : > { %3093 = vmatprep.subr.bf16.mxu1 %v3874_v57  ;;  %2730 = vmatmul.mubr.f32.vlgmr.msra.gmra.mrb[16].mxu0 %v3280_v42 }
 0x20a   : > { %2732 = vmatprep.mubr.f32.mxu0 %v3281_v45 }
 0x20b   : > { %2686 = vmatmul.mubr.f32.vlgmr.msra.gmra.mrb[0].mxu1 %v3835_v1  ;;  %v1550_v1 = vld [vmem:[#allocation2 + $0xe1] sm:$0xff] }
 0x20c   : > { %2688 = vmatprep.mubr.f32.mxu1 %v3840_v8  ;;  %3101 = vmatpush3.bf16.msra.mxu1 %v3874_v57  ;;  %v3283_v8 = vld [vmem:[%s3728_s6 + $0x20] sm:$0xff] }
 0x20d   : > { %3094 = vmatprep.subr.bf16.mxu1 %v3877_v4  ;;  %2733 = vmatmul.mubr.f32.gmra.mrb[18].mxu0 %v3282_v46 }
 0x20f   : > { %2689 = vmatmul.mubr.f32.gmra.mrb[2].mxu1 %v3843_v12  ;;  %v3284_v12 = vld [vmem:[%s3728_s6 + $0x28] sm:$0xff] }
 0x210   : > { %2691 = vmatprep.mubr.f32.mxu1 %v3848_v19  ;;  %3102 = vmatpush3.bf16.msra.mxu1 %v3877_v4  ;;  %v3285_v19 = vld [vmem:[%s3728_s6 + $0x30] sm:$0xff] }
 0x211   : > { %3095 = vmatprep.subr.bf16.mxu1 %v3884_v17 }
 0x213   : > { %2692 = vmatmul.mubr.f32.gmra.mrb[4].mxu1 %v3851_v23  ;;  %v3286_v23 = vld [vmem:[%s3728_s6 + $0x38] sm:$0xff]  ;;  %s3405_s6 = sshll.u32 %s3484_s11, 4  ;;  %s3406_s6 = int_to_ptr.vmem [resolvable:$false] %s3405_s6 }
 0x214   : > { %2694 = vmatprep.mubr.f32.mxu1 %v3855_v28  ;;  %3103 = vmatpush3.bf16.msra.mxu1 %v3884_v17  ;;  %v1985_v17 = vld [vmem:[%s4006_s4 + $0x2] ss:$0 sm:$0xff]  ;;  %s3407_s24 = scalar_lea.vmem %s3406_s6, 2048  ;;  %p3408_p12 = scmp.lt.s32.totalorder %s3950_s12, %s3406_s6 }
 0x215   : > { %3096 = vmatprep.subr.bf16.mxu1 %v3892_v36  ;;  %p3409_p1 = scmp.lt.s32.totalorder %s3407_s24, %s3401_s8 }
 0x217   : > { %2695 = vmatmul.mubr.f32.gmra.mrb[6].mxu1 %v1550_v1  ;;  %p3410_p2 = por %p3409_p1, %p3408_p12 }
 0x218   : > { %3104 = vmatpush3.bf16.msra.mxu1 %v3892_v36  ;;  %2735 = vmatprep.mubr.f32.mxu1 %v3283_v8 }
 0x219   : > { %3097 = vmatprep.subr.bf16.mxu1 %v3900_v25  ;;  %p3411_p4 = pnand %p3410_p2, %p3404_p7 }
 0x21c   : > { %3105 = vmatpush3.bf16.msra.mxu1 %v3900_v25 }
 0x21d   : > { %3098 = vmatprep.subr.bf16.mxu1 %v3081_v58 }
 0x220   : > { %3106 = vmatpush3.bf16.msra.mxu1 %v3081_v58 }
 0x221   : > { %3099 = vmatprep.subr.bf16.mxu1 %v3085_v38 }
 0x224   : > { %3107 = vmatpush3.bf16.msra.mxu1 %v3085_v38 }
 0x225   : > { %3100 = vmatprep.subr.bf16.mxu1 %v3089_v40 }
 0x228   : > { %3108 = vmatpush3.bf16.msra.mxu1 %v3089_v40 }
 0x22b   : > { %2736 = vmatmul.mubr.f32.vlgmr.msra.gmra.mrb[4].mxu1 %v3284_v12 }
 0x22c   : > { %2738 = vmatprep.mubr.f32.mxu1 %v3285_v19 }
 0x22f   : > { %2739 = vmatmul.mubr.f32.gmra.mrb[6].mxu1 %v3286_v23 }
 0x2bc   : > { %v2467_v28 = vpop.f32.mrb[8].mxu0 }
 0x2bd   : > { %v943_v47 = vpop.f32.mrb[9].mxu0 }
 0x2c0   : > { %v2470_v48 = vpop.f32.mrb[10].mxu0 }
 0x2c1   : > { %v953_v49 = vpop.f32.mrb[11].mxu0 }
 0x2c4   : > { %v2473_v53 = vpop.f32.mrb[12].mxu0 }
 0x2c5   : > { %v963_v50 = vpop.f32.mrb[13].mxu0  ;;  %v3125_v27 = vadd.f32 %v2473_v53, %v1983_v63 }
 0x2c6   : > { %v3128_v5 = vadd.f32 %v1983_v63, %v963_v50 }
 0x2c7   : > { %v3126_v6 = vadd.f32 %v3125_v27, %v1985_v17 }
 0x2c8   : > { %v2476_v29 = vpop.f32.mrb[14].mxu0  ;;  %v3129_v32 = vadd.f32 %v3128_v5, %v1985_v17 }
 0x2c9   : > { %v973_v51 = vpop.f32.mrb[15].mxu0  ;;  %v3131_v31 = vadd.f32 %v2476_v29, %v1983_v63 }
 0x2ca   : > { %v3134_v58 = vadd.f32 %v1983_v63, %v973_v51 }
 0x2cb   : > { %v3132_v15 = vadd.f32 %v3131_v31, %v1985_v17 }
 0x2cc   : > { %v3135_v16 = vadd.f32 %v3134_v58, %v1985_v17 }
 0x2dc   : > { %v2731_v52 = vpop.f32.mrb[16].mxu0 }
 0x2dd   : > { %v1787_v54 = vpop.f32.mrb[17].mxu0 }
 0x2de   : > { %v2687_v55 = vpop.f32.mrb[0].mxu1 }
 0x2df   : > { %v3109_v57 = vadd.f32 %v2687_v55, %v2467_v28  ;;  %v1634_v59 = vpop.f32.mrb[1].mxu1 }
 0x2e0   : > { %v3113_v0 = vadd.f32 %v1634_v59, %v943_v47  ;;  %v2734_v2 = vpop.f32.mrb[18].mxu0 }
 0x2e1   : > { %v3110_v3 = vadd.f32 %v3109_v57, %v1983_v63  ;;  %v1797_v4 = vpop.f32.mrb[19].mxu0 }
 0x2e2   : > { %v2690_v7 = vpop.f32.mrb[2].mxu1  ;;  %v3114_v9 = vadd.f32 %v3113_v0, %v1983_v63 }
 0x2e3   : > { %v3117_v11 = vadd.f32 %v2690_v7, %v2470_v48  ;;  %v3111_v13 = vadd.f32 %v3110_v3, %v2731_v52  ;;  %v1644_v14 = vpop.f32.mrb[3].mxu1 }
 0x2e4   : > { %v3121_v18 = vadd.f32 %v1644_v14, %v953_v49  ;;  %v3115_v30 = vadd.f32 %v3114_v9, %v1787_v54 }
 0x2e5   : > { %v3118_v22 = vadd.f32 %v3117_v11, %v1983_v63  ;;  %v3112_v20 = vadd.f32 %v3111_v13, %v1985_v17 }
 0x2e6   : > { %v3122_v21 = vadd.f32 %v3121_v18, %v1983_v63  ;;  %v3116_v36 = vadd.f32 %v3115_v30, %v1985_v17 }
 0x2e7   : > { %v1835_v35 = vmax.f32 %v3112_v20, 0.0  ;;  %v3119_v61 = vadd.f32 %v3118_v22, %v1985_v17 }
 0x2e8   : > { %v1834_v62 = vmax.f32 %v3116_v36, 0.0  ;;  %v3123_v24 = vadd.f32 %v3122_v21, %v1985_v17 }
 0x2e9   : > { %1843 = vst [vmem:[%s3941_s28 + $0x8] sm:$0xff] %v1835_v35  ;;  %v3120_v44 = vadd.f32 %v3119_v61, %v2734_v2 }
 0x2ea   : > { %1842 = vst [vmem:[%s3941_s28] sm:$0xff] %v1834_v62  ;;  %v3124_v25 = vadd.f32 %v3123_v24, %v1797_v4 }
 0x2eb   : > { %v1837_v43 = vmax.f32 %v3120_v44, 0.0 }
 0x2ec   : > { %v1836_v26 = vmax.f32 %v3124_v25, 0.0 }
 0x2ed   : > { %1845 = vst [vmem:[%s3941_s28 + $0x18] sm:$0xff] %v1837_v43 }
 0x2ee   : > { %1844 = vst [vmem:[%s3941_s28 + $0x10] sm:$0xff] %v1836_v26 }
 0x2fe   : > { %v2737_v56 = vpop.f32.mrb[4].mxu1 }
 0x2ff   : > { %v3127_v33 = vadd.f32 %v3126_v6, %v2737_v56  ;;  %v1807_v34 = vpop.f32.mrb[5].mxu1 }
 0x300   : > { %v3130_v37 = vadd.f32 %v3129_v32, %v1807_v34 }
 0x301   : > { %v1839_v38 = vmax.f32 %v3127_v33, 0.0 }
 0x302   : > { %v1838_v39 = vmax.f32 %v3130_v37, 0.0  ;;  %v2740_v10 = vpop.f32.mrb[6].mxu1 }
 0x303   : > { %1847 = vst [vmem:[%s3941_s28 + $0x28] sm:$0xff] %v1839_v38  ;;  %v3133_v60 = vadd.f32 %v3132_v15, %v2740_v10  ;;  %v1817_v40 = vpop.f32.mrb[7].mxu1 }
 0x304   : > { %1846 = vst [vmem:[%s3941_s28 + $0x20] sm:$0xff] %v1838_v39  ;;  %v3136_v41 = vadd.f32 %v3135_v16, %v1817_v40 }
 0x305   : > { %v1841_v42 = vmax.f32 %v3133_v60, 0.0 }
 0x306   : > { %v1840_v45 = vmax.f32 %v3136_v41, 0.0 }
 0x307   : > { %1849 = vst [vmem:[%s3941_s28 + $0x38] sm:$0xff] %v1841_v42 }
 0x308   : > { %1848 = vst [vmem:[%s3941_s28 + $0x30] sm:$0xff] %v1840_v45 }
 0x309   : > { %3414 = shalt.err (!%p3411_p4)
}
 0x30a   : > { %s3415_s26 = scalar_lea.hbm %s3956_s10, 1024  ;;  %s3419_s13 = scalar_lea.hbm %s4007_s5, 2048 }
 0x30b   : > { %p3416_p9 = scmp.ne.s32.totalorder %s3956_s10, %s3415_s26  ;;  %p3420_p8 = scmp.lt.u32.totalorder %s3956_s10, %s4007_s5 }
 0x30c   : > { %p3421_p13 = scmp.lt.u32.totalorder %s3419_s13, %s3415_s26  ;;  %p3423_p10 = scmp.lt.u32.totalorder %s3415_s26, %s3956_s10 }
 0x30d   : > { %p3417_p0 = pnand %p3416_p9, %p3671_p5 }
 0x30e   : > { %p3422_p6 = por %p3421_p13, %p3420_p8 }
 0x30f   : > { %p3418_p11 = pneg %p3417_p0 }
 0x310   : > { %p3424_p3 = por %p3423_p10, %p3422_p6 }
 0x312   : > { %p3425_p7 = pnand %p3424_p3, %p3418_p11 }
 0x314   : > { %3428 = shalt.err (!%p3425_p7)
}
 0x315   : > { %s3485_s9 = smov 128   ;;  %s3486_s15 = smov 8  }
 0x316   : > { %3211 = dma.vmem_to_hbm [thread:$0]  (%p3671_p5), %s3950_s12, 1024, %s3956_s10, %s1851_s22, %s3485_s9, %s3485_s9, %s3486_s15  }
 0x317 PF: > { %s1879_s17 = sand.u32 1, %s3463_s18   ;;  %p4025_p12 = scmp.ne.s32.totalorder %s4012_s25, 0 }
 0x318   : > { %p4026_p1 = scmp.ge.s32.totalorder %s3475_s21, 2  ;;  %s1880_s8 = scalar_lea.sflag [#allocation5], %s1879_s17 }
 0x31a   : > { %p3228_p2 = pnand %p4026_p1, %p4025_p12 }
 0x31c   : > { %3458 = dma.done.wait (!%p3228_p2), %s1880_s8, 1024  }
 0x31d   : > { %3460 = vsyncadd (!%p3228_p2), %s1880_s8, 4294966272  ;;  %p20_p4 = scmp.ge.s32.totalorder %s3657_s14, 4   ;;  %s4027_s18 = smov %s3467_s19 }
 0x31e   : > { %s4028_s19 = smov %s3471_s20  ;;  %s4029_s20 = smov %s3667_s30 }
 0x31f   : > { %s4030_s21 = smov %s3657_s14  ;;  %22 = sbr.rel (!%p20_p4) target bundleno = 7 (0x7), region = 110 }
 0x326   :  { %1885 = vsyncpa [#allocation4], 1 }
 0x327   :  { %1887 = vsyncpa [#allocation4 + $0x1], 1 }
 0x328   :  { %1888 = vsyncpa [#allocation7], 1 }
 0x329   :  { %1889 = vsyncpa [#allocation10], 1 }
 0x32a   :  { %1890 = vsyncpa [#allocation5], 1 }
 0x32b   :  { %1892 = vsyncpa [#allocation5 + $0x1], 1 }

</bundles_post_ra>
